<compile_context>
chip_gen: v6e
topology: v6e:2x2x1
jax: 0.10.0
libtpu: 0.0.40
codegen_flags: <defaults>
</compile_context>

<pallas_src>
import numpy as np
import jax
import jax.numpy as jnp
from jax import lax
from jax.experimental import pallas as pl
from jax.experimental.pallas import tpu as pltpu

_I32_MIN = -2147483648
_I32_MAX = 2147483647


def _round_up(x, m):
    return ((x + m - 1) // m) * m


def _resident_spec(shape):
    """BlockSpec for an operand whose block never changes across the grid.

    Single-buffer it when this JAX version supports pipeline_mode; fall back to
    a plain (double-buffered) spec otherwise so the script always runs.
    """
    index_map = lambda i: (0,) * len(shape)
    try:
        return pl.BlockSpec(shape, index_map, pipeline_mode=pl.Buffered(1))
    except (TypeError, AttributeError):
        return pl.BlockSpec(shape, index_map)


def _pick_tile_n(n, d, p, n_levels, *, target=8192, vmem_budget=28 << 20):
    """Largest row tile (multiple of 8) whose VMEM footprint fits the budget.

    The footprint accounts for the (8,128) lane padding of narrow D/P operands:
    double-buffered x and (L,tn,D) quant blocks plus the big in-kernel
    intermediates (packed distances, enc_all, quant_all).
    """
    lane = lambda v: max(128, _round_up(v, 128))
    dpad, ppad = lane(d), lane(p)
    per_row = 4 * (2 * dpad                # x block, double buffered
                   + 2 * n_levels * dpad   # quant block, double buffered
                   + 2 * ppad              # dist / packed keys
                   + n_levels * ppad       # enc_all
                   + n_levels * dpad)      # quant_all
    tn = min(target, max(8, vmem_budget // per_row))
    tn = max(8, tn - (tn % 8))
    # keep >= 2 tiles whenever possible so a v7x megacore can split the grid
    if n > 8:
        tn = min(tn, _round_up((n + 1) // 2, 8))
    return max(8, tn)


def _make_avq_kernel(n_total, tile_n, n_levels, p, idx_bits):
    """Build the fused all-levels kernel (static shapes baked in via closure)."""
    idx_mask = (1 << idx_bits) - 1

    def kernel(x_ref, cbt_ref, cb_ref, c2_ref, src_ref, q_ref, err_ref):
        # x_ref   : (TN, D) f32   tile of flattened (padded) inputs
        # cbt_ref : (D,  P) f32   -2 * codebook.T        (resident)
        # cb_ref  : (P,  D) f32   codebook               (resident)
        # c2_ref  : (1,  P) f32   sum(codebook**2, 1)    (resident)
        # src_ref : (L,  P) i32   noisy-channel column source maps (resident)
        # q_ref   : (L, TN, D) f32  quantized output tile, all levels
        # err_ref : (1, 8, 128) f32 per-tile squared-error partials (lane l = level l)
        x = x_ref[...]                                                 # (TN, D)

        # shared distance (up to a per-row constant): -2 x.c + ||c||^2
        dist = (jnp.dot(x, cbt_ref[...], preferred_element_type=jnp.float32)
                + c2_ref[...])                                         # (TN, P)

        # order-preserving int32 key of dist, column index packed into low bits
        bits = pltpu.bitcast(dist, jnp.int32)
        okey = jnp.where(bits >= 0, bits,
                         jnp.bitwise_xor(jnp.bitwise_not(bits), jnp.int32(_I32_MIN)))
        col = lax.broadcasted_iota(jnp.int32, (1, p), 1)               # (1, P)
        packed = jnp.bitwise_or(jnp.bitwise_and(okey, jnp.int32(~idx_mask)), col)

        src = src_ref[...]                                             # (L, P)
        encs = []
        for l in range(n_levels):                                      # L is small & static
            k_act = 2 ** (l + 1)                                       # active prefix
            masked = jnp.where(col < k_act, packed, jnp.int32(_I32_MAX))
            m = jnp.min(masked, axis=1, keepdims=True)                 # one reduce / level
            idx = jnp.bitwise_and(m, jnp.int32(idx_mask))              # (TN, 1) argmin
            # transmitted (post-channel) encodings: enc[n, i] = (argmin_n == src[l, i])
            encs.append((idx == src[l:l + 1, :]).astype(jnp.float32))  # (TN, P)

        # one batched one-hot gather matmul for all levels
        enc_all = jnp.concatenate(encs, axis=0)                        # (L*TN, P)
        quant_all = jnp.dot(enc_all, cb_ref[...],
                            preferred_element_type=jnp.float32)        # (L*TN, D)

        # padded rows (beyond n_total) are excluded from the error sums
        rows_valid = n_total - pl.program_id(0) * tile_n
        row_ok = lax.broadcasted_iota(jnp.int32, (tile_n, 1), 0) < rows_valid

        lane = lax.broadcasted_iota(jnp.int32, (8, 128), 1)
        err = jnp.zeros((8, 128), jnp.float32)
        for l in range(n_levels):
            q_l = quant_all[l * tile_n:(l + 1) * tile_n, :]            # static slice
            q_ref[l] = q_l
            diff = q_l - x
            err = jnp.where(lane == l,
                            jnp.sum(jnp.where(row_ok, diff * diff, 0.0)), err)
        err_ref[0] = err

    return kernel


def quantize_all_levels(flat_x, codebook, n_levels, srcs):
    """All codebook levels through one fused Pallas kernel.

    Returns (quant, sq_err): quant (L, N, D) f32, sq_err (L,) f32 (sum of squared
    error per level over the N*D valid elements).
    """
    n, d = flat_x.shape
    p = codebook.shape[0]

    tn = _pick_tile_n(n, d, p, n_levels)
    n_pad = _round_up(n, tn)
    num_tiles = n_pad // tn

    x = flat_x.astype(jnp.float32)
    if n_pad != n:
        x = jnp.pad(x, ((0, n_pad - n), (0, 0)))

    codebook = codebook.astype(jnp.float32)
    cbt = (-2.0 * codebook).T                                          # (D, P), -2 folded in
    c2 = jnp.sum(codebook * codebook, axis=1)[None, :]                 # (1, P)
    src = jnp.stack(srcs).astype(jnp.int32)                            # (L, P)
    idx_bits = max(1, int(np.ceil(np.log2(p)))) if p > 1 else 1

    kernel = _make_avq_kernel(n, tn, n_levels, p, idx_bits)

    quant, err_part = pl.pallas_call(
        kernel,
        out_shape=(
            jax.ShapeDtypeStruct((n_levels, n_pad, d), jnp.float32),
            jax.ShapeDtypeStruct((num_tiles, 8, 128), jnp.float32),
        ),
        grid_spec=pltpu.PrefetchScalarGridSpec(
            num_scalar_prefetch=0,
            grid=(num_tiles,),
            in_specs=[
                pl.BlockSpec((tn, d), lambda i: (i, 0)),               # x (tiled over rows)
                _resident_spec((d, p)),                                # -2 * codebook^T
                _resident_spec((p, d)),                                # codebook
                _resident_spec((1, p)),                                # ||c||^2
                _resident_spec((n_levels, p)),                         # channel src maps
            ],
            out_specs=[
                pl.BlockSpec((n_levels, tn, d), lambda i: (0, i, 0)),  # quant, all levels
                pl.BlockSpec((1, 8, 128), lambda i: (i, 0, 0)),        # error partials
            ],
        ),
        # no cross-iteration state -> fully parallel grid (v7x megacore shardable)
        compiler_params=pltpu.CompilerParams(
            dimension_semantics=("parallel",),
            vmem_limit_bytes=48 * 1024 * 1024),
    )(x, cbt, codebook, c2, src)

    sq_err = jnp.sum(err_part[:, 0, :n_levels], axis=0)                # (L,)
    return quant[:, :n, :], sq_err


class AdaptiveVectorQuantizer:
    """JAX/Pallas port of the PyTorch AdaptiveVectorQuantizer (training-mode forward)."""

    def __init__(self, num_embeddings, codebook_size, lambda_c=0.1, lambda_p=0.33,
                 key=jax.random.PRNGKey(0)):
        self.d = num_embeddings
        self.p = codebook_size
        self.lambda_c = lambda_c
        self.lambda_p = lambda_p
        # nn.Embedding(p, d) with uniform_(-1/p, 1/p), deterministic init
        self.codebook = jax.random.uniform(
            key, (self.p, self.d), minval=-1.0 / self.p, maxval=1.0 / self.p,
            dtype=jnp.float32)
        self.training = True

    def _channel_src(self, key, correct_p):
        # Same remap rule as the PyTorch noisy channel, with a jax.random stream.
        u = jax.random.uniform(key, (self.p,))
        i = jnp.arange(self.p, dtype=jnp.int32)
        step = (1.0 - correct_p) / self.p
        integer = jnp.floor((u - correct_p) / step).astype(jnp.int32)
        shifted = (i + 1 + integer) % self.p
        return jnp.where(u <= correct_p, i, shifted).astype(jnp.int32)

    def __call__(self, inputs, num_vectors, prev_vecs, correct_p, noise_key):
        # inputs: (B, H, W, D) channels-last, D == self.d
        B, H, W, D = inputs.shape
        assert D == self.d
        N = B * H * W
        flat_input = inputs.reshape(N, D).astype(jnp.float32)
        n_levels = int(np.log2(num_vectors))
        keys = jax.random.split(noise_key, n_levels)
        srcs = [self._channel_src(keys[na], correct_p) for na in range(n_levels)]

        # one fused Pallas call for all levels
        quant_all, sq_errs = quantize_all_levels(flat_input, self.codebook, n_levels, srcs)
        mses = sq_errs / float(N * D)                                   # per-level MSE(quant, x)

        # `actives` carries its value from the last level, as in the original module.
        actives = self.codebook[:num_vectors]

        quant_vecs, losses = [], []
        for na in range(n_levels):
            q = quant_all[na].reshape(B, H, W, D)
            if self.training:
                q_latent_loss = mses[na]                                # MSE(quant, inputs)
                if na == 0:
                    prox_loss = 0.0
                    e_latent_loss = mses[na]
                elif na == 1:
                    e_latent_loss = mses[na]
                    m = 2 ** na                                         # pow(2, na+1) // 2
                    prox_loss = na * self.lambda_p * jnp.mean(
                        (prev_vecs[:m] - actives[:m]) ** 2)
                else:
                    e_latent_loss = 0.0
                    m = 2 ** na
                    prox_loss = self.lambda_p * jnp.mean(
                        (prev_vecs[:m] - actives[:m]) ** 2)
                cb_loss = q_latent_loss + self.lambda_c * e_latent_loss + prox_loss
                # straight-through estimator only changes gradients; forward value unchanged.
                # NCHW permute kept for parity with the torch training path (wrapper glue).
                q = jnp.transpose(q, (0, 3, 1, 2))
            else:
                cb_loss = 0.0
            quant_vecs.append(q)
            losses.append(cb_loss)
        return quant_vecs, losses, actives, srcs


def _reference_quantize(flat_x, codebook, k_active, src):
    """Pure-JAX reference of one level, for a sanity check."""
    dist = (jnp.sum(flat_x ** 2, axis=1, keepdims=True)
            + jnp.sum(codebook ** 2, axis=1)[None, :]
            - 2.0 * flat_x @ codebook.T)
    dist = jnp.where(jnp.arange(codebook.shape[0])[None, :] < k_active, dist, 1e30)
    idx = jnp.argmin(dist, axis=1)
    enc = (idx[:, None] == src[None, :]).astype(jnp.float32)
    return enc @ codebook


if __name__ == "__main__":
    key = jax.random.PRNGKey(0)
    k_cb, k_in, k_prev, k_noise = jax.random.split(key, 4)

    D = 16          # num_embeddings
    P = 8           # codebook_size
    B, H, W = 2, 8, 8
    num_vectors = 8
    correct_p = 0.9

    vq = AdaptiveVectorQuantizer(num_embeddings=D, codebook_size=P, key=k_cb)
    inputs = jax.random.normal(k_in, (B, H, W, D), dtype=jnp.float32)
    prev_vecs = jax.random.normal(k_prev, (P, D), dtype=jnp.float32) * 0.1

    quant_vecs, losses, actives, srcs = vq(inputs, num_vectors, prev_vecs, correct_p, k_noise)

    for q in quant_vecs:
        jax.block_until_ready(q)
    for l in losses:
        jax.block_until_ready(jnp.asarray(l))
    jax.block_until_ready(actives)

    # sanity check vs pure-JAX reference (same channel src maps)
    flat = inputs.reshape(-1, D)
    for na, src in enumerate(srcs):
        ref = _reference_quantize(flat, vq.codebook, 2 ** (na + 1), src)
        got = jnp.transpose(quant_vecs[na], (0, 2, 3, 1)).reshape(-1, D)
        np.testing.assert_allclose(np.asarray(got), np.asarray(ref), atol=1e-5, rtol=1e-5)
        assert np.isfinite(float(jnp.asarray(losses[na])))

    print("KERNEL_OK")
</pallas_src>

<mosaic_0001>
module attributes {stable_mosaic.version = 11 : i64} {
  func.func @kernel(%arg0: i32, %arg1: memref<64x16xf32, #tpu.memory_space<vmem>>, %arg2: memref<16x8xf32, #tpu.memory_space<vmem>>, %arg3: memref<8x16xf32, #tpu.memory_space<vmem>>, %arg4: memref<1x8xf32, #tpu.memory_space<vmem>>, %arg5: memref<3x8xi32, #tpu.memory_space<vmem>>, %arg6: memref<3x64x16xf32, #tpu.memory_space<vmem>>, %arg7: memref<1x8x128xf32, #tpu.memory_space<vmem>>) attributes {dimension_semantics = [#tpu.dimension_semantics<parallel>], iteration_bounds = array<i64: 2>, scalar_prefetch = 0 : i64, scratch_operands = 0 : i64, tpu.core_type = #tpu.core_type<tc>, window_params = [{transform_indices = @transform_0, window_bounds = array<i64: 64, 16>}, {pipeline_mode = #tpu.pipeline_mode<synchronous>, transform_indices = @transform_1, window_bounds = array<i64: 16, 8>}, {pipeline_mode = #tpu.pipeline_mode<synchronous>, transform_indices = @transform_2, window_bounds = array<i64: 8, 16>}, {pipeline_mode = #tpu.pipeline_mode<synchronous>, transform_indices = @transform_3, window_bounds = array<i64: 1, 8>}, {pipeline_mode = #tpu.pipeline_mode<synchronous>, transform_indices = @transform_4, window_bounds = array<i64: 3, 8>}, {transform_indices = @transform_5, window_bounds = array<i64: 3, 64, 16>}, {transform_indices = @transform_6, window_bounds = array<i64: 1, 8, 128>}]} {
    %c0 = arith.constant 0 : index
    %c0_0 = arith.constant 0 : index
    %0 = vector.load %arg1[%c0, %c0_0] : memref<64x16xf32, #tpu.memory_space<vmem>>, vector<64x16xf32>
    %c0_1 = arith.constant 0 : index
    %c0_2 = arith.constant 0 : index
    %1 = vector.load %arg2[%c0_1, %c0_2] : memref<16x8xf32, #tpu.memory_space<vmem>>, vector<16x8xf32>
    %cst = arith.constant dense<0.000000e+00> : vector<64x8xf32>
    %2 = tpu.matmul %0, %1, %cst {dimension_numbers = #tpu.dot_dimension_numbers<[1], [0], [0], [1], [0, 0, 1, 1], [], []>} : vector<64x16xf32>, vector<16x8xf32>, vector<64x8xf32> -> vector<64x8xf32>
    %c0_3 = arith.constant 0 : index
    %c0_4 = arith.constant 0 : index
    %3 = vector.load %arg4[%c0_3, %c0_4] : memref<1x8xf32, #tpu.memory_space<vmem>>, vector<1x8xf32>
    %4 = vector.broadcast %3 : vector<1x8xf32> to vector<64x8xf32>
    %5 = arith.addf %2, %4 : vector<64x8xf32>
    %6 = tpu.bitcast %5 : vector<64x8xf32> -> vector<64x8xi32>
    %c0_i32 = arith.constant 0 : i32
    %7 = vector.broadcast %c0_i32 : i32 to vector<64x8xi32>
    %8 = arith.cmpi sge, %6, %7 : vector<64x8xi32>
    %cst_5 = arith.constant dense<-1> : vector<64x8xi32>
    %9 = arith.xori %6, %cst_5 : vector<64x8xi32>
    %c-2147483648_i32 = arith.constant -2147483648 : i32
    %10 = vector.broadcast %c-2147483648_i32 : i32 to vector<64x8xi32>
    %11 = arith.xori %9, %10 : vector<64x8xi32>
    %12 = arith.select %8, %6, %11 : vector<64x8xi1>, vector<64x8xi32>
    %13 = tpu.iota {dimensions = array<i32: 1>} : vector<1x8xi32>
    %c-8_i32 = arith.constant -8 : i32
    %14 = vector.broadcast %c-8_i32 : i32 to vector<64x8xi32>
    %15 = arith.andi %12, %14 : vector<64x8xi32>
    %16 = vector.broadcast %13 : vector<1x8xi32> to vector<64x8xi32>
    %17 = arith.ori %15, %16 : vector<64x8xi32>
    %c0_6 = arith.constant 0 : index
    %c0_7 = arith.constant 0 : index
    %18 = vector.load %arg5[%c0_6, %c0_7] : memref<3x8xi32, #tpu.memory_space<vmem>>, vector<3x8xi32>
    %c2_i32 = arith.constant 2 : i32
    %19 = vector.broadcast %c2_i32 : i32 to vector<1x8xi32>
    %20 = arith.cmpi slt, %13, %19 : vector<1x8xi32>
    %c2147483647_i32 = arith.constant 2147483647 : i32
    %21 = vector.shape_cast %20 : vector<1x8xi1> to vector<1x8xi1>
    %22 = vector.broadcast %21 : vector<1x8xi1> to vector<64x8xi1>
    %23 = vector.broadcast %c2147483647_i32 : i32 to vector<64x8xi32>
    %24 = arith.select %22, %17, %23 : vector<64x8xi1>, vector<64x8xi32>
    %cst_8 = arith.constant dense<2147483647> : vector<64xi32>
    %25 = vector.multi_reduction <minsi>, %24, %cst_8 [1] : vector<64x8xi32> to vector<64xi32>
    %26 = vector.shape_cast %25 : vector<64xi32> to vector<64x1xi32>
    %c7_i32 = arith.constant 7 : i32
    %27 = vector.broadcast %c7_i32 : i32 to vector<64x1xi32>
    %28 = arith.andi %26, %27 : vector<64x1xi32>
    %29 = vector.extract_strided_slice %18 {offsets = [0, 0], sizes = [1, 8], strides = [1, 1]} : vector<3x8xi32> to vector<1x8xi32>
    %30 = vector.broadcast %28 : vector<64x1xi32> to vector<64x8xi32>
    %31 = vector.broadcast %29 : vector<1x8xi32> to vector<64x8xi32>
    %32 = arith.cmpi eq, %30, %31 : vector<64x8xi32>
    %33 = arith.extui %32 : vector<64x8xi1> to vector<64x8xi32>
    %34 = arith.sitofp %33 : vector<64x8xi32> to vector<64x8xf32>
    %c4_i32 = arith.constant 4 : i32
    %35 = vector.broadcast %c4_i32 : i32 to vector<1x8xi32>
    %36 = arith.cmpi slt, %13, %35 : vector<1x8xi32>
    %c2147483647_i32_9 = arith.constant 2147483647 : i32
    %37 = vector.shape_cast %36 : vector<1x8xi1> to vector<1x8xi1>
    %38 = vector.broadcast %37 : vector<1x8xi1> to vector<64x8xi1>
    %39 = vector.broadcast %c2147483647_i32_9 : i32 to vector<64x8xi32>
    %40 = arith.select %38, %17, %39 : vector<64x8xi1>, vector<64x8xi32>
    %cst_10 = arith.constant dense<2147483647> : vector<64xi32>
    %41 = vector.multi_reduction <minsi>, %40, %cst_10 [1] : vector<64x8xi32> to vector<64xi32>
    %42 = vector.shape_cast %41 : vector<64xi32> to vector<64x1xi32>
    %c7_i32_11 = arith.constant 7 : i32
    %43 = vector.broadcast %c7_i32_11 : i32 to vector<64x1xi32>
    %44 = arith.andi %42, %43 : vector<64x1xi32>
    %45 = vector.extract_strided_slice %18 {offsets = [1, 0], sizes = [1, 8], strides = [1, 1]} : vector<3x8xi32> to vector<1x8xi32>
    %46 = vector.broadcast %44 : vector<64x1xi32> to vector<64x8xi32>
    %47 = vector.broadcast %45 : vector<1x8xi32> to vector<64x8xi32>
    %48 = arith.cmpi eq, %46, %47 : vector<64x8xi32>
    %49 = arith.extui %48 : vector<64x8xi1> to vector<64x8xi32>
    %50 = arith.sitofp %49 : vector<64x8xi32> to vector<64x8xf32>
    %c8_i32 = arith.constant 8 : i32
    %51 = vector.broadcast %c8_i32 : i32 to vector<1x8xi32>
    %52 = arith.cmpi slt, %13, %51 : vector<1x8xi32>
    %c2147483647_i32_12 = arith.constant 2147483647 : i32
    %53 = vector.shape_cast %52 : vector<1x8xi1> to vector<1x8xi1>
    %54 = vector.broadcast %53 : vector<1x8xi1> to vector<64x8xi1>
    %55 = vector.broadcast %c2147483647_i32_12 : i32 to vector<64x8xi32>
    %56 = arith.select %54, %17, %55 : vector<64x8xi1>, vector<64x8xi32>
    %cst_13 = arith.constant dense<2147483647> : vector<64xi32>
    %57 = vector.multi_reduction <minsi>, %56, %cst_13 [1] : vector<64x8xi32> to vector<64xi32>
    %58 = vector.shape_cast %57 : vector<64xi32> to vector<64x1xi32>
    %c7_i32_14 = arith.constant 7 : i32
    %59 = vector.broadcast %c7_i32_14 : i32 to vector<64x1xi32>
    %60 = arith.andi %58, %59 : vector<64x1xi32>
    %61 = vector.extract_strided_slice %18 {offsets = [2, 0], sizes = [1, 8], strides = [1, 1]} : vector<3x8xi32> to vector<1x8xi32>
    %62 = vector.broadcast %60 : vector<64x1xi32> to vector<64x8xi32>
    %63 = vector.broadcast %61 : vector<1x8xi32> to vector<64x8xi32>
    %64 = arith.cmpi eq, %62, %63 : vector<64x8xi32>
    %65 = arith.extui %64 : vector<64x8xi1> to vector<64x8xi32>
    %66 = arith.sitofp %65 : vector<64x8xi32> to vector<64x8xf32>
    %67 = tpu.concatenate %34, %50, %66 in 0 : vector<64x8xf32>, vector<64x8xf32>, vector<64x8xf32> -> vector<192x8xf32>
    %c0_15 = arith.constant 0 : index
    %c0_16 = arith.constant 0 : index
    %68 = vector.load %arg3[%c0_15, %c0_16] : memref<8x16xf32, #tpu.memory_space<vmem>>, vector<8x16xf32>
    %cst_17 = arith.constant dense<0.000000e+00> : vector<192x16xf32>
    %69 = tpu.matmul %67, %68, %cst_17 {dimension_numbers = #tpu.dot_dimension_numbers<[1], [0], [0], [1], [0, 0, 1, 1], [], []>} : vector<192x8xf32>, vector<8x16xf32>, vector<192x16xf32> -> vector<192x16xf32>
    %c64_i32 = arith.constant 64 : i32
    %70 = arith.muli %arg0, %c64_i32 : i32
    %c128_i32 = arith.constant 128 : i32
    %71 = arith.subi %c128_i32, %70 : i32
    %72 = tpu.iota {dimensions = array<i32: 0>} : vector<64x1xi32>
    %73 = vector.broadcast %71 : i32 to vector<64x1xi32>
    %74 = arith.cmpi slt, %72, %73 : vector<64x1xi32>
    %75 = tpu.iota {dimensions = array<i32: 1>} : vector<8x128xi32>
    %cst_18 = arith.constant 0.000000e+00 : f32
    %76 = vector.broadcast %cst_18 : f32 to vector<8x128xf32>
    %77 = vector.extract_strided_slice %69 {offsets = [0, 0], sizes = [64, 16], strides = [1, 1]} : vector<192x16xf32> to vector<64x16xf32>
    %c0_19 = arith.constant 0 : index
    %c0_20 = arith.constant 0 : index
    %c0_21 = arith.constant 0 : index
    %78 = vector.load %arg6[%c0_19, %c0_20, %c0_21] : memref<3x64x16xf32, #tpu.memory_space<vmem>>, vector<1x64x16xf32>
    %79 = vector.shape_cast %78 : vector<1x64x16xf32> to vector<64x16xf32>
    %80 = vector.shape_cast %77 : vector<64x16xf32> to vector<1x64x16xf32>
    tpu.vector_store %arg6[%c0_19, %c0_20, %c0_21], %80 {strides = array<i32>} : memref<3x64x16xf32, #tpu.memory_space<vmem>>, vector<1x64x16xf32>,
    %81 = arith.subf %77, %0 : vector<64x16xf32>
    %c0_i32_22 = arith.constant 0 : i32
    %82 = vector.broadcast %c0_i32_22 : i32 to vector<8x128xi32>
    %83 = arith.cmpi eq, %75, %82 : vector<8x128xi32>
    %84 = arith.mulf %81, %81 : vector<64x16xf32>
    %cst_23 = arith.constant 0.000000e+00 : f32
    %85 = vector.shape_cast %74 : vector<64x1xi1> to vector<64x1xi1>
    %86 = vector.broadcast %85 : vector<64x1xi1> to vector<64x16xi1>
    %87 = vector.broadcast %cst_23 : f32 to vector<64x16xf32>
    %88 = arith.select %86, %84, %87 : vector<64x16xi1>, vector<64x16xf32>
    %89 = vector.shape_cast %88 : vector<64x16xf32> to vector<1x64x16xf32>
    %cst_24 = arith.constant dense<0.000000e+00> : vector<1xf32>
    %90 = vector.multi_reduction <add>, %89, %cst_24 [1, 2] : vector<1x64x16xf32> to vector<1xf32>
    %91 = vector.shape_cast %90 : vector<1xf32> to vector<1x1x1xf32>
    %92 = vector.extract %91[0, 0, 0] : f32 from vector<1x1x1xf32>
    %93 = vector.broadcast %92 : f32 to vector<8x128xf32>
    %94 = arith.select %83, %93, %76 : vector<8x128xi1>, vector<8x128xf32>
    %95 = vector.extract_strided_slice %69 {offsets = [64, 0], sizes = [64, 16], strides = [1, 1]} : vector<192x16xf32> to vector<64x16xf32>
    %c1 = arith.constant 1 : index
    %c0_25 = arith.constant 0 : index
    %c0_26 = arith.constant 0 : index
    %96 = vector.load %arg6[%c1, %c0_25, %c0_26] : memref<3x64x16xf32, #tpu.memory_space<vmem>>, vector<1x64x16xf32>
    %97 = vector.shape_cast %96 : vector<1x64x16xf32> to vector<64x16xf32>
    %98 = vector.shape_cast %95 : vector<64x16xf32> to vector<1x64x16xf32>
    tpu.vector_store %arg6[%c1, %c0_25, %c0_26], %98 {strides = array<i32>} : memref<3x64x16xf32, #tpu.memory_space<vmem>>, vector<1x64x16xf32>,
    %99 = arith.subf %95, %0 : vector<64x16xf32>
    %c1_i32 = arith.constant 1 : i32
    %100 = vector.broadcast %c1_i32 : i32 to vector<8x128xi32>
    %101 = arith.cmpi eq, %75, %100 : vector<8x128xi32>
    %102 = arith.mulf %99, %99 : vector<64x16xf32>
    %cst_27 = arith.constant 0.000000e+00 : f32
    %103 = vector.shape_cast %74 : vector<64x1xi1> to vector<64x1xi1>
    %104 = vector.broadcast %103 : vector<64x1xi1> to vector<64x16xi1>
    %105 = vector.broadcast %cst_27 : f32 to vector<64x16xf32>
    %106 = arith.select %104, %102, %105 : vector<64x16xi1>, vector<64x16xf32>
    %107 = vector.shape_cast %106 : vector<64x16xf32> to vector<1x64x16xf32>
    %cst_28 = arith.constant dense<0.000000e+00> : vector<1xf32>
    %108 = vector.multi_reduction <add>, %107, %cst_28 [1, 2] : vector<1x64x16xf32> to vector<1xf32>
    %109 = vector.shape_cast %108 : vector<1xf32> to vector<1x1x1xf32>
    %110 = vector.extract %109[0, 0, 0] : f32 from vector<1x1x1xf32>
    %111 = vector.broadcast %110 : f32 to vector<8x128xf32>
    %112 = arith.select %101, %111, %94 : vector<8x128xi1>, vector<8x128xf32>
    %113 = vector.extract_strided_slice %69 {offsets = [128, 0], sizes = [64, 16], strides = [1, 1]} : vector<192x16xf32> to vector<64x16xf32>
    %c2 = arith.constant 2 : index
    %c0_29 = arith.constant 0 : index
    %c0_30 = arith.constant 0 : index
    %114 = vector.load %arg6[%c2, %c0_29, %c0_30] : memref<3x64x16xf32, #tpu.memory_space<vmem>>, vector<1x64x16xf32>
    %115 = vector.shape_cast %114 : vector<1x64x16xf32> to vector<64x16xf32>
    %116 = vector.shape_cast %113 : vector<64x16xf32> to vector<1x64x16xf32>
    tpu.vector_store %arg6[%c2, %c0_29, %c0_30], %116 {strides = array<i32>} : memref<3x64x16xf32, #tpu.memory_space<vmem>>, vector<1x64x16xf32>,
    %117 = arith.subf %113, %0 : vector<64x16xf32>
    %c2_i32_31 = arith.constant 2 : i32
    %118 = vector.broadcast %c2_i32_31 : i32 to vector<8x128xi32>
    %119 = arith.cmpi eq, %75, %118 : vector<8x128xi32>
    %120 = arith.mulf %117, %117 : vector<64x16xf32>
    %cst_32 = arith.constant 0.000000e+00 : f32
    %121 = vector.shape_cast %74 : vector<64x1xi1> to vector<64x1xi1>
    %122 = vector.broadcast %121 : vector<64x1xi1> to vector<64x16xi1>
    %123 = vector.broadcast %cst_32 : f32 to vector<64x16xf32>
    %124 = arith.select %122, %120, %123 : vector<64x16xi1>, vector<64x16xf32>
    %125 = vector.shape_cast %124 : vector<64x16xf32> to vector<1x64x16xf32>
    %cst_33 = arith.constant dense<0.000000e+00> : vector<1xf32>
    %126 = vector.multi_reduction <add>, %125, %cst_33 [1, 2] : vector<1x64x16xf32> to vector<1xf32>
    %127 = vector.shape_cast %126 : vector<1xf32> to vector<1x1x1xf32>
    %128 = vector.extract %127[0, 0, 0] : f32 from vector<1x1x1xf32>
    %129 = vector.broadcast %128 : f32 to vector<8x128xf32>
    %130 = arith.select %119, %129, %112 : vector<8x128xi1>, vector<8x128xf32>
    %c0_34 = arith.constant 0 : index
    %c0_35 = arith.constant 0 : index
    %c0_36 = arith.constant 0 : index
    %131 = vector.load %arg7[%c0_34, %c0_35, %c0_36] : memref<1x8x128xf32, #tpu.memory_space<vmem>>, vector<1x8x128xf32>
    %132 = vector.shape_cast %131 : vector<1x8x128xf32> to vector<8x128xf32>
    %133 = vector.shape_cast %130 : vector<8x128xf32> to vector<1x8x128xf32>
    tpu.vector_store %arg7[%c0_34, %c0_35, %c0_36], %133 {strides = array<i32>} : memref<1x8x128xf32, #tpu.memory_space<vmem>>, vector<1x8x128xf32>,
    return
  }
  func.func @transform_0(%arg0: i32) -> (i32, i32) {
    %c0_i32 = arith.constant 0 : i32
    %c0_i32_0 = arith.constant 0 : i32
    return %arg0, %c0_i32 : i32, i32
  }
  func.func @transform_1(%arg0: i32) -> (i32, i32) {
    %c0_i32 = arith.constant 0 : i32
    %c0_i32_0 = arith.constant 0 : i32
    %c0_i32_1 = arith.constant 0 : i32
    return %c0_i32, %c0_i32_0 : i32, i32
  }
  func.func @transform_2(%arg0: i32) -> (i32, i32) {
    %c0_i32 = arith.constant 0 : i32
    %c0_i32_0 = arith.constant 0 : i32
    %c0_i32_1 = arith.constant 0 : i32
    return %c0_i32, %c0_i32_0 : i32, i32
  }
  func.func @transform_3(%arg0: i32) -> (i32, i32) {
    %c0_i32 = arith.constant 0 : i32
    %c0_i32_0 = arith.constant 0 : i32
    %c0_i32_1 = arith.constant 0 : i32
    return %c0_i32, %c0_i32_0 : i32, i32
  }
  func.func @transform_4(%arg0: i32) -> (i32, i32) {
    %c0_i32 = arith.constant 0 : i32
    %c0_i32_0 = arith.constant 0 : i32
    %c0_i32_1 = arith.constant 0 : i32
    return %c0_i32, %c0_i32_0 : i32, i32
  }
  func.func @transform_5(%arg0: i32) -> (i32, i32, i32) {
    %c0_i32 = arith.constant 0 : i32
    %c0_i32_0 = arith.constant 0 : i32
    %c0_i32_1 = arith.constant 0 : i32
    return %c0_i32, %arg0, %c0_i32_0 : i32, i32, i32
  }
  func.func @transform_6(%arg0: i32) -> (i32, i32, i32) {
    %c0_i32 = arith.constant 0 : i32
    %c0_i32_0 = arith.constant 0 : i32
    %c0_i32_1 = arith.constant 0 : i32
    return %arg0, %c0_i32, %c0_i32_0 : i32, i32, i32
  }
}

</mosaic_0001>

<bundles_post_ra>
// kernel: tpu_custom_call.1
= control target key start
LH: loop header
LB: loop body
LE: loop exit
PB: predicated region body
PF: predicated region fallthrough
CT: control target
= control target key end

     0   :  { %12 = vsyncpa [#allocation4], 0  ;;  %s3012_s0 = inlined_call_operand.vmem [shape: f32[128,16], index: 0, kind: input, shape index: {}]   ;;  %s3013_s1 = inlined_call_operand.vmem [shape: f32[16,8], index: 1, kind: input, shape index: {}]   ;;  %s3014_s2 = inlined_call_operand.vmem [shape: f32[8,16], index: 2, kind: input, shape index: {}]   ;;  %s3015_s3 = inlined_call_operand.vmem [shape: f32[1,8], index: 3, kind: input, shape index: {}]   ;;  %s3016_s4 = inlined_call_operand.vmem [shape: s32[3,8], index: 4, kind: input, shape index: {}]   ;;  %s3017_s5 = inlined_call_operand.vmem [shape: f32[3,128,16], index: 5, kind: output, shape index: {0}]   ;;  %s3018_s6 = inlined_call_operand.hbm [shape: f32[2,8,128], index: 6, kind: output, shape index: {1}]  }
   0x1   :  { %14 = vsyncpa [#allocation4 + $0x1], 0  ;;  %s2011_s21 = smov 0   ;;  %s2013_s22 = smov 0  }
   0x2   :  { %s2015_s23 = smov 0   ;;  %s2017_s24 = smov 0  }
   0x3 LB: > { %s2032_s25 = sadd.s32 4294967295, %s1972_s24   ;;  %s1678_s26 = sadd.s32 4294967294, %s1972_s24   ;;  %s1972_s24 = sphi %s2017_s24, %s3038_s24   ;;  %s1968_s23 = sphi %s2015_s23, %s3037_s23   ;;  %s1964_s22 = sphi %s2013_s22, %s3036_s22   ;;  %s1960_s21 = sphi %s2011_s21, %s3035_s21  }
   0x4   : > { %s2036_s27 = sadd.s32 1, %s1972_s24   ;;  %s137_s28 = sadd.s32 1, %s1968_s23 }
   0x5   : > { %s134_s29 = ssub.s32 %s1972_s24, %s2036_s27  ;;  %p147_p0 = scmp.ne.s32.totalorder %s1968_s23, %s1964_s22 }
   0x6   : > { %p135_p1 = scmp.eq.s32.totalorder %s134_s29, 0  ;;  %p148_p2 = scmp.eq.s32.totalorder %s2032_s25, 1 }
   0x7   : > { %p179_p3 = scmp.ne.s32.totalorder %s1964_s22, %s1960_s21  ;;  %p180_p4 = scmp.eq.s32.totalorder %s1678_s26, 1 }
   0x8   : > { %s2047_s30 = scalar_select %p135_p1, %s1968_s23, %s137_s28  }
   0x9   : > { %p2049_p5 = por %p148_p2, %p147_p0  ;;  %p2053_p6 = por %p180_p4, %p179_p3 }
   0xa   : > { %p1681_p7 = scmp.ge.s32.totalorder %s1972_s24, 1  ;;  %p219_p8 = scmp.lt.s32.totalorder %s1972_s24, 3 }
   0xc   : > { %p220_p9 = pnand %p1681_p7, %p219_p8 }
   0xd   : > { %s1683_s13 = sshll.u32 (!%p220_p9), %s2032_s25, 3  ;;  %s2664_s9 = sand.u32 (!%p220_p9), 1, %s1964_s22  }
   0xe   : > { %223 = sbr.rel (%p220_p9) target bundleno = 1004 (0x3ec), region = 40  ;;  %p254_p10 = scmp.lt.s32.totalorder (!%p220_p9), %s1683_s13, 15 }
   0xf   : > { %s1857_s10 = smul.u32 (!%p220_p9), 192, %s2664_s9  ;;  %s1742_s12 = sshll.u32 (!%p220_p9), %s2032_s25, 6 }
  0x10   : > { %s1682_s16 = sshll.u32 (!%p220_p9), %s2664_s9, 3  ;;  %s1447_s19 = scalar_lea.sflag (!%p220_p9), [#allocation4], %s2664_s9 }
  0x11   : > { %s2669_s11 = scalar_lea.vmem (!%p220_p9), [#allocation2], %s1857_s10  ;;  %s2915_s18 = scalar_lea.vmem (!%p220_p9), [#allocation3], %s1682_s16 }
  0x13   : > { %v269_v0 = vld [vmem:[%s3013_s1 + $0x8] sm:$0xff]  ;;  %v268_v1 = vld [vmem:[%s3013_s1] sm:$0xff]  ;;  %s3040_s13 = smov (!%p254_p10, %s1683_s13), 15  ;;  %vm277_vm0 = vcmask 130048   ;;  %v447_v11 = vlaneseq  ;;  %vm477_vm4 = vcmask 64512   ;;  %s2926_s28 = scalar_lea.vmem (%p2049_p5), %s3017_s5, %s1742_s12 }
  0x14   : > { %1801 = vmatprep.subr.mxu0 %v269_v0  ;;  %s1684_s14 = sshll.u32 %s3040_s13, 3  ;;  %v1685_v10 = vld [vmem:[%s3015_s3] ss:$0 sm:$0xff]  ;;  %s1227_s13 = ssub.s32 128, %s1742_s12 }
  0x15   : > { %1802 = vmatpush3.msra.mxu0 %v269_v0  ;;  %s2069_s17 = scalar_lea.vmem %s3012_s0, %s1684_s14  ;;  %v2091_v16 = vand.u32 127, %v447_v11 }
  0x16   : > { %1803 = vmatprep.subr.mxu0 %v268_v1  ;;  %v260_v2 = vld [vmem:[%s2069_s17] sm:$0xff]  ;;  %v261_v3 = vld [vmem:[%s2069_s17 + $0x8] sm:$0xff]  ;;  %v262_v4 = vld [vmem:[%s2069_s17 + $0x10] sm:$0xff] }
  0x17   : > { %1804 = vmatpush3.msra.mxu0 %v268_v1  ;;  %1805 = vmatprep.mubr.msk.f32.mxu0 %vm277_vm0, %v260_v2  ;;  %v263_v5 = vld [vmem:[%s2069_s17 + $0x18] sm:$0xff]  ;;  %v264_v6 = vld [vmem:[%s2069_s17 + $0x20] sm:$0xff]  ;;  %v265_v7 = vld [vmem:[%s2069_s17 + $0x28] sm:$0xff]  ;;  %vm634_vm2 = vcmp.lt.s32.totalorder %v2091_v16, 4  ;;  %vm466_vm11 = vcmp.lt.s32.totalorder %v2091_v16, 2  ;;  %vm801_vm12 = vcmp.lt.s32.totalorder %v2091_v16, 8 }
  0x18   : > { %1806 = vmatmul.mubr.msk.f32.vlgmr.msra.gmra.mxu0 %vm277_vm0, %v261_v3  ;;  %v266_v8 = vld [vmem:[%s2069_s17 + $0x30] sm:$0xff]  ;;  %v267_v9 = vld [vmem:[%s2069_s17 + $0x38] sm:$0xff] }
  0x19   : > { %1808 = vmatprep.mubr.msk.f32.mxu0 %vm277_vm0, %v262_v4 }
  0x1c   : > { %1809 = vmatmul.mubr.msk.f32.gmra.mxu0 %vm277_vm0, %v263_v5 }
  0x1d   : > { %1811 = vmatprep.mubr.msk.f32.mxu0 %vm277_vm0, %v264_v6 }
  0x20   : > { %1812 = vmatmul.mubr.msk.f32.gmra.mxu0 %vm277_vm0, %v265_v7 }
  0x21   : > { %1814 = vmatprep.mubr.msk.f32.mxu0 %vm277_vm0, %v266_v8 }
  0x24   : > { %1815 = vmatmul.mubr.msk.f32.gmra.mxu0 %vm277_vm0, %v267_v9 }
  0xd8   : > { %v1807_v12 = vpop.f32.mrf.mxu0 }
  0xd9   : > { %v374_v13 = vadd.f32 %v1807_v12, %v1685_v10 }
  0xda   : > { %v368_v14 = vpop.f32.mrf.mxu0 }
  0xdb   : > { %v424_v15 = vxor.u32 4294967295, %v374_v13  ;;  %v369_v17 = vadd.f32 %v1685_v10, %v368_v14  ;;  %vm416_vm1 = vcmp.ge.s32.totalorder %v374_v13, 0 }
  0xdc   : > { %v1810_v18 = vpop.f32.mrf.mxu0 }
  0xdd   : > { %v432_v19 = vxor.u32 2147483648, %v424_v15  ;;  %v423_v20 = vxor.u32 4294967295, %v369_v17  ;;  %v384_v21 = vadd.f32 %v1810_v18, %v1685_v10  ;;  %vm415_vm3 = vcmp.ge.s32.totalorder %v369_v17, 0 }
  0xde   : > { %v378_v22 = vpop.f32.mrf.mxu0 }
  0xdf   : > { %v440_v23 = vsel %vm416_vm1, %v374_v13, %v432_v19  ;;  %v431_v24 = vxor.u32 2147483648, %v423_v20  ;;  %v426_v25 = vxor.u32 4294967295, %v384_v21  ;;  %v379_v27 = vadd.f32 %v1685_v10, %v378_v22 }
  0xe0   : > { %v450_v26 = vand.u32 4294967288, %v440_v23  ;;  %v1813_v28 = vpop.f32.mrf.mxu0  ;;  %vm418_vm5 = vcmp.ge.s32.totalorder %v384_v21, 0 }
  0xe1   : > { %v439_v29 = vsel %vm415_vm3, %v369_v17, %v431_v24  ;;  %v434_v30 = vxor.u32 2147483648, %v426_v25  ;;  %v394_v31 = vadd.f32 %v1813_v28, %v1685_v10  ;;  %vm417_vm6 = vcmp.ge.s32.totalorder %v379_v27, 0 }
  0xe2   : > { %v2095_v32 = vor.u32 %v450_v26, %v2091_v16  ;;  %v449_v33 = vand.u32 4294967288, %v439_v29  ;;  %v425_v34 = vxor.u32 4294967295, %v379_v27  ;;  %v388_v35 = vpop.f32.mrf.mxu0 }
  0xe3   : > { %v442_v36 = vsel %vm418_vm5, %v384_v21, %v434_v30  ;;  %vm420_vm7 = vcmp.ge.s32.totalorder %v394_v31, 0  ;;  %v428_v37 = vxor.u32 4294967295, %v394_v31  ;;  %v389_v38 = vadd.f32 %v1685_v10, %v388_v35 }
  0xe4   : > { %v2098_v39 = vor.u32 %v449_v33, %v2091_v16  ;;  %v452_v40 = vand.u32 4294967288, %v442_v36  ;;  %v433_v41 = vxor.u32 2147483648, %v425_v34  ;;  %v1816_v42 = vpop.f32.mrf.mxu0  ;;  %v638_v43 = vsel %vm634_vm2, %v2095_v32, 2147483647 }
  0xe5   : > { %v436_v44 = vxor.u32 2147483648, %v428_v37  ;;  %vm419_vm8 = vcmp.ge.s32.totalorder %v389_v38, 0  ;;  %v427_v45 = vxor.u32 4294967295, %v389_v38  ;;  %v404_v46 = vadd.f32 %v1816_v42, %v1685_v10 }
  0xe6   : > { %v2104_v47 = vor.u32 %v452_v40, %v2091_v16  ;;  %v441_v48 = vsel %vm417_vm6, %v379_v27, %v433_v41  ;;  %v398_v49 = vpop.f32.mrf.mxu0  ;;  %v2108_v50 = vsel %vm477_vm4, %v638_v43, 2147483647  ;;  %v637_v51 = vsel %vm634_vm2, %v2098_v39, 2147483647 }
  0xe7   : > { %v451_v52 = vand.u32 4294967288, %v441_v48  ;;  %v444_v53 = vsel %vm420_vm7, %v394_v31, %v436_v44  ;;  %v435_v54 = vxor.u32 2147483648, %v427_v45  ;;  %vm422_vm9 = vcmp.ge.s32.totalorder %v404_v46, 0 }
  0xe8   : > { %v454_v55 = vand.u32 4294967288, %v444_v53  ;;  %v430_v56 = vxor.u32 4294967295, %v404_v46  ;;  %v399_v57 = vadd.f32 %v1685_v10, %v398_v49  ;;  %v662_v58 = vshra.s32 %v2108_v50, 16 }
  0xe9   : > { %v2116_v59 = vor.u32 %v451_v52, %v2091_v16  ;;  %v443_v60 = vsel %vm419_vm8, %v389_v38, %v435_v54  ;;  %v2120_v61 = vsel %vm477_vm4, %v637_v51, 2147483647  ;;  %v640_v62 = vsel %vm634_vm2, %v2104_v47, 2147483647 }
  0xea   : > { %v2126_v63 = vor.u32 %v454_v55, %v2091_v16  ;;  %v453_v0 = vand.u32 4294967288, %v443_v60  ;;  %v438_v1 = vxor.u32 2147483648, %v430_v56  ;;  %v429_v2 = vxor.u32 4294967295, %v399_v57 }
  0xeb   : > { %v2128_v3 = vcvt.s32.f32 %v662_v58  ;;  %v647_v4 = vshra.s32 %v2120_v61, 16  ;;  %v639_v5 = vsel %vm634_vm2, %v2116_v59, 2147483647  ;;  %v2142_v9 = vsel %vm477_vm4, %v640_v62, 2147483647 }
  0xec   : > { %v2135_v6 = vor.u32 %v453_v0, %v2091_v16  ;;  %v446_v7 = vsel %vm422_vm9, %v404_v46, %v438_v1  ;;  %v2139_v8 = vsel %vm477_vm4, %v639_v5, 2147483647  ;;  %vm421_vm10 = vcmp.ge.s32.totalorder %v399_v57, 0 }
  0xed   : > { %v456_v10 = vand.u32 4294967288, %v446_v7  ;;  %v437_v12 = vxor.u32 2147483648, %v429_v2  ;;  %665 = vmin.xlane.f32.xlu1 %v2128_v3  ;;  %v677_v13 = vshra.s32 %v2139_v8, 16  ;;  %v2146_v14 = vcvt.s32.f32 %v647_v4 }
  0xee   : > { %v692_v15 = vshra.s32 %v2142_v9, 16  ;;  %v641_v17 = vsel %vm634_vm2, %v2135_v6, 2147483647  ;;  %v642_v18 = vsel %vm634_vm2, %v2126_v63, 2147483647 }
  0xef   : > { %v2156_v19 = vor.u32 %v456_v10, %v2091_v16  ;;  %v445_v20 = vsel %vm421_vm10, %v399_v57, %v437_v12  ;;  %v2158_v21 = vcvt.s32.f32 %v677_v13  ;;  %v2161_v22 = vsel %vm477_vm4, %v641_v17, 2147483647 }
  0xf0   : > { %v455_v23 = vand.u32 4294967288, %v445_v20  ;;  %v707_v24 = vshra.s32 %v2161_v22, 16  ;;  %v2165_v25 = vsel %vm477_vm4, %v642_v18, 2147483647  ;;  %v2184_v31 = vcvt.s32.f32 %v692_v15 }
  0xf1   : > { %650 = vmin.xlane.f32.xlu1 %v2146_v14  ;;  %680 = vmin.xlane.f32.xlu0 %v2158_v21  ;;  %v476_v26 = vsel %vm466_vm11, %v2156_v19, 2147483647  ;;  %v644_v27 = vsel %vm634_vm2, %v2156_v19, 2147483647  ;;  %v722_v33 = vshra.s32 %v2165_v25, 16 }
  0xf2   : > { %v2177_v28 = vor.u32 %v455_v23, %v2091_v16  ;;  %v2179_v29 = vcvt.s32.f32 %v707_v24  ;;  %v2182_v30 = vsel %vm477_vm4, %v476_v26, 2147483647  ;;  %v2189_v35 = vsel %vm477_vm4, %v644_v27, 2147483647 }
  0xf3   : > { %v585_v34 = vshra.s32 %v2182_v30, 16  ;;  %v470_v38 = vsel %vm466_vm11, %v2095_v32, 2147483647  ;;  %v469_v40 = vsel %vm466_vm11, %v2098_v39, 2147483647  ;;  %v2206_v41 = vcvt.s32.f32 %v722_v33 }
  0xf4   : > { %v475_v36 = vsel %vm466_vm11, %v2177_v28, 2147483647  ;;  %v752_v43 = vshra.s32 %v2189_v35, 16  ;;  %v2213_v45 = vsel %vm477_vm4, %v470_v38, 2147483647 }
  0xf5   : > { %695 = vmin.xlane.f32.xlu1 %v2184_v31  ;;  %710 = vmin.xlane.f32.xlu0 %v2179_v29  ;;  %v2197_v37 = vsel %vm477_vm4, %v475_v36, 2147483647  ;;  %v2208_v42 = vcvt.s32.f32 %v585_v34  ;;  %v2216_v46 = vsel %vm477_vm4, %v469_v40, 2147483647  ;;  %v805_v48 = vsel %vm801_vm12, %v2095_v32, 2147483647 }
  0xf6   : > { %v570_v44 = vshra.s32 %v2197_v37, 16  ;;  %v804_v49 = vsel %vm801_vm12, %v2098_v39, 2147483647  ;;  %v2226_v51 = vcvt.s32.f32 %v752_v43  ;;  %v495_v53 = vshra.s32 %v2213_v45, 16 }
  0xf7   : > { %v480_v54 = vshra.s32 %v2216_v46, 16  ;;  %v2233_v55 = vsel %vm477_vm4, %v805_v48, 2147483647  ;;  %v2236_v56 = vsel %vm477_vm4, %v804_v49, 2147483647 }
  0xf8   : > { %v2228_v52 = vcvt.s32.f32 %v570_v44  ;;  %v472_v32 = vsel %vm466_vm11, %v2104_v47, 2147483647  ;;  %v471_v39 = vsel %vm466_vm11, %v2116_v59, 2147483647  ;;  %v2246_v57 = vcvt.s32.f32 %v495_v53 }
  0xf9   : > { %725 = vmin.xlane.f32.xlu1 %v2206_v41  ;;  %588 = vmin.xlane.f32.xlu0 %v2208_v42  ;;  %v2248_v58 = vcvt.s32.f32 %v480_v54  ;;  %v829_v60 = vshra.s32 %v2233_v55, 16  ;;  %v814_v62 = vshra.s32 %v2236_v56, 16  ;;  %v2253_v0 = vsel %vm477_vm4, %v472_v32, 2147483647 }
  0xfa   : > { %v2256_v1 = vsel %vm477_vm4, %v471_v39, 2147483647  ;;  %v807_v2 = vsel %vm801_vm12, %v2104_v47, 2147483647  ;;  %v643_v4 = vsel %vm634_vm2, %v2177_v28, 2147483647 }
  0xfb   : > { %v2266_v5 = vcvt.s32.f32 %v829_v60  ;;  %v2268_v7 = vcvt.s32.f32 %v814_v62  ;;  %v525_v10 = vshra.s32 %v2253_v0, 16  ;;  %v510_v12 = vshra.s32 %v2256_v1, 16 }
  0xfc   : > { %v2273_v13 = vsel %vm477_vm4, %v807_v2, 2147483647  ;;  %v2276_v15 = vsel %vm477_vm4, %v643_v4, 2147483647  ;;  %v474_v47 = vsel %vm466_vm11, %v2126_v63, 2147483647 }
  0xfd   : > { %755 = vmin.xlane.f32.xlu1 %v2226_v51  ;;  %573 = vmin.xlane.f32.xlu0 %v2228_v52  ;;  %v806_v17 = vsel %vm801_vm12, %v2116_v59, 2147483647  ;;  %v2286_v18 = vcvt.s32.f32 %v525_v10  ;;  %v2288_v20 = vcvt.s32.f32 %v510_v12  ;;  %v859_v23 = vshra.s32 %v2273_v13, 16 }
  0xfe   : > { %v737_v24 = vshra.s32 %v2276_v15, 16  ;;  %v2293_v26 = vsel %vm477_vm4, %v474_v47, 2147483647  ;;  %v2296_v27 = vsel %vm477_vm4, %v806_v17, 2147483647 }
  0xff   : > { %v809_v59 = vsel %vm801_vm12, %v2126_v63, 2147483647  ;;  %v473_v33 = vsel %vm466_vm11, %v2135_v6, 2147483647  ;;  %v2306_v34 = vcvt.s32.f32 %v859_v23  ;;  %v555_v38 = vshra.s32 %v2293_v26, 16 }
 0x100   : > { %v2308_v36 = vcvt.s32.f32 %v737_v24  ;;  %v844_v40 = vshra.s32 %v2296_v27, 16  ;;  %v2313_v43 = vsel %vm477_vm4, %v809_v59, 2147483647  ;;  %v2316_v44 = vsel %vm477_vm4, %v473_v33, 2147483647 }
 0x101   : > { %498 = vmin.xlane.f32.xlu1 %v2246_v57  ;;  %483 = vmin.xlane.f32.xlu0 %v2248_v58  ;;  %v811_v63 = vsel %vm801_vm12, %v2156_v19, 2147483647  ;;  %v808_v48 = vsel %vm801_vm12, %v2135_v6, 2147483647  ;;  %v2326_v49 = vcvt.s32.f32 %v555_v38  ;;  %v889_v54 = vshra.s32 %v2313_v43, 16 }
 0x102   : > { %v2328_v53 = vcvt.s32.f32 %v844_v40  ;;  %v540_v32 = vshra.s32 %v2316_v44, 16  ;;  %v2333_v39 = vsel %vm477_vm4, %v811_v63, 2147483647  ;;  %v2336_v60 = vsel %vm477_vm4, %v808_v48, 2147483647 }
 0x103   : > { %v810_v6 = vsel %vm801_vm12, %v2177_v28, 2147483647  ;;  %v2343_v19 = vcvt.s32.f32 %v889_v54  ;;  %v919_v2 = vshra.s32 %v2333_v39, 16  ;;  %v874_v4 = vshra.s32 %v2336_v60, 16 }
 0x104   : > { %v2345_v62 = vcvt.s32.f32 %v540_v32  ;;  %v2350_v10 = vsel %vm477_vm4, %v810_v6, 2147483647  ;;  %v661_v23 = vand.u32 65535, %v2108_v50  ;;  %v646_v33 = vand.u32 65535, %v2120_v61 }
 0x105   : > { %832 = vmin.xlane.f32.xlu1 %v2266_v5  ;;  %817 = vmin.xlane.f32.xlu0 %v2268_v7  ;;  %v2354_v12 = vcvt.s32.f32 %v919_v2  ;;  %v2356_v47 = vcvt.s32.f32 %v874_v4  ;;  %v904_v28 = vshra.s32 %v2350_v10, 16  ;;  %v691_v54 = vand.u32 65535, %v2142_v9 }
 0x106   : > { %v663_v59 = vcvt.s32.f32 %v661_v23  ;;  %v648_v48 = vcvt.s32.f32 %v646_v33  ;;  %v676_v32 = vand.u32 65535, %v2139_v8  ;;  %v721_v4 = vand.u32 65535, %v2165_v25 }
 0x107   : > { %v2361_v17 = vcvt.s32.f32 %v904_v28  ;;  %v693_v6 = vcvt.s32.f32 %v691_v54  ;;  %v706_v9 = vand.u32 65535, %v2161_v22  ;;  %v584_v25 = vand.u32 65535, %v2182_v30 }
 0x108   : > { %v678_v2 = vcvt.s32.f32 %v676_v32  ;;  %v723_v23 = vcvt.s32.f32 %v721_v4  ;;  %v569_v22 = vand.u32 65535, %v2197_v37  ;;  %v751_v30 = vand.u32 65535, %v2189_v35 }
 0x109   : > { %528 = vmin.xlane.f32.xlu1 %v2286_v18  ;;  %513 = vmin.xlane.f32.xlu0 %v2288_v20  ;;  %v479_v37 = vand.u32 65535, %v2216_v46  ;;  %v494_v35 = vand.u32 65535, %v2213_v45  ;;  %v813_v46 = vand.u32 65535, %v2236_v56  ;;  %v828_v45 = vand.u32 65535, %v2233_v55 }
 0x10a   : > { %v571_v54 = vcvt.s32.f32 %v569_v22  ;;  %v509_v56 = vand.u32 65535, %v2256_v1  ;;  %v524_v55 = vand.u32 65535, %v2253_v0  ;;  %v736_v1 = vand.u32 65535, %v2276_v15 }
 0x10b   : > { %v858_v0 = vand.u32 65535, %v2273_v13  ;;  %v843_v15 = vand.u32 65535, %v2296_v27  ;;  %v554_v13 = vand.u32 65535, %v2293_v26  ;;  %v539_v27 = vand.u32 65535, %v2316_v44 }
 0x10c   : > { %v511_v22 = vcvt.s32.f32 %v509_v56  ;;  %v888_v26 = vand.u32 65535, %v2313_v43  ;;  %v873_v44 = vand.u32 65535, %v2336_v60  ;;  %v918_v43 = vand.u32 65535, %v2333_v39 }
 0x10d   : > { %862 = vmin.xlane.f32.xlu1 %v2306_v34  ;;  %740 = vmin.xlane.f32.xlu0 %v2308_v36  ;;  %v903_v60 = vand.u32 65535, %v2350_v10 }
 0x10e   : > { %v920_v10 = vcvt.s32.f32 %v918_v43 }
 0x10f   : > { %v905_v56 = vcvt.s32.f32 %v903_v60 }
 0x111   : > { %558 = vmin.xlane.f32.xlu1 %v2326_v49  ;;  %847 = vmin.xlane.f32.xlu0 %v2328_v53 }
 0x115   : > { %892 = vmin.xlane.f32.xlu1 %v2343_v19  ;;  %543 = vmin.xlane.f32.xlu0 %v2345_v62 }
 0x119   : > { %922 = vmin.xlane.f32.xlu1 %v2354_v12  ;;  %877 = vmin.xlane.f32.xlu0 %v2356_v47 }
 0x11d   : > { %907 = vmin.xlane.f32.xlu0 %v2361_v17 }
 0x176   : > { %v2365_v24 = vpop.xlane.xlu1 %665 }
 0x177   : > { %vm667_vm13 = vcmp.eq.f32.partialorder %v2128_v3, %v2365_v24 }
 0x178   : > { %v668_v38 = vsel %vm667_vm13, %v663_v59, inf  ;;  %v708_v59 = vcvt.s32.f32 %v706_v9 }
 0x179   : > { %669 = vmin.xlane.f32.xlu1 %v668_v38 }
 0x17a   : > { %v2370_v40 = vpop.xlane.xlu1 %650  ;;  %v2372_v63 = vpop.xlane.xlu0 %680 }
 0x17b   : > { %vm652_vm14 = vcmp.eq.f32.partialorder %v2146_v14, %v2370_v40  ;;  %vm682_vm15 = vcmp.eq.f32.partialorder %v2158_v21, %v2372_v63 }
 0x17c   : > { %v653_v50 = vsel %vm652_vm14, %v648_v48, inf  ;;  %v683_v14 = vsel %vm682_vm15, %v678_v2, inf  ;;  %v586_v48 = vcvt.s32.f32 %v584_v25  ;;  %v481_v2 = vcvt.s32.f32 %v479_v37 }
 0x17d   : > { %654 = vmin.xlane.f32.xlu0 %v653_v50  ;;  %v830_v25 = vcvt.s32.f32 %v828_v45 }
 0x17e   : > { %v2380_v61 = vpop.xlane.xlu1 %695  ;;  %v2382_v3 = vpop.xlane.xlu0 %710 }
 0x17f   : > { %vm697_vm1 = vcmp.eq.f32.partialorder %v2184_v31, %v2380_v61  ;;  %vm712_vm2 = vcmp.eq.f32.partialorder %v2179_v29, %v2382_v3 }
 0x180   : > { %v698_v8 = vsel %vm697_vm1, %v693_v6, inf  ;;  %v713_v33 = vsel %vm712_vm2, %v708_v59, inf  ;;  %v753_v6 = vcvt.s32.f32 %v751_v30 }
 0x181   : > { %699 = vmin.xlane.f32.xlu1 %v698_v8  ;;  %684 = vmin.xlane.f32.xlu0 %v683_v14  ;;  %v496_v8 = vcvt.s32.f32 %v494_v35  ;;  %v815_v14 = vcvt.s32.f32 %v813_v46  ;;  %v556_v35 = vcvt.s32.f32 %v554_v13  ;;  %v541_v46 = vcvt.s32.f32 %v539_v27 }
 0x182   : > { %v2390_v21 = vpop.xlane.xlu1 %725  ;;  %v2392_v28 = vpop.xlane.xlu0 %588 }
 0x183   : > { %vm727_vm3 = vcmp.eq.f32.partialorder %v2206_v41, %v2390_v21  ;;  %vm590_vm5 = vcmp.eq.f32.partialorder %v2208_v42, %v2392_v28 }
 0x184   : > { %v728_v31 = vsel %vm727_vm3, %v723_v23, inf  ;;  %v591_v41 = vsel %vm590_vm5, %v586_v48, inf  ;;  %v526_v48 = vcvt.s32.f32 %v524_v55  ;;  %v657_v55 = vcvt.f32.s32 %v2370_v40 }
 0x185   : > { %729 = vmin.xlane.f32.xlu1 %v728_v31  ;;  %714 = vmin.xlane.f32.xlu0 %v713_v33 }
 0x186   : > { %v2400_v29 = vpop.xlane.xlu1 %755  ;;  %v2402_v38 = vpop.xlane.xlu0 %573 }
 0x187   : > { %vm575_vm6 = vcmp.eq.f32.partialorder %v2228_v52, %v2402_v38  ;;  %vm757_vm7 = vcmp.eq.f32.partialorder %v2226_v51, %v2400_v29  ;;  %v580_v40 = vcvt.f32.s32 %v2402_v38 }
 0x188   : > { %v576_v32 = vsel %vm575_vm6, %v571_v54, inf  ;;  %v758_v52 = vsel %vm757_vm7, %v753_v6, inf  ;;  %v738_v54 = vcvt.s32.f32 %v736_v1  ;;  %v687_v1 = vcvt.f32.s32 %v2372_v63 }
 0x189   : > { %592 = vmin.xlane.f32.xlu1 %v591_v41  ;;  %577 = vmin.xlane.f32.xlu0 %v576_v32  ;;  %v860_v41 = vcvt.s32.f32 %v858_v0  ;;  %v845_v32 = vcvt.s32.f32 %v843_v15  ;;  %v595_v0 = vcvt.f32.s32 %v2392_v28  ;;  %v658_v15 = vshll.u32 %v657_v55, 16 }
 0x18a   : > { %v2410_v42 = vpop.xlane.xlu1 %498  ;;  %v2412_v50 = vpop.xlane.xlu0 %483  ;;  %v2500_v28 = vshrl.u32 %v447_v11, 7 }
 0x18b   : > { %vm485_vm8 = vcmp.eq.f32.partialorder %v2248_v58, %v2412_v50  ;;  %vm500_vm9 = vcmp.eq.f32.partialorder %v2246_v57, %v2410_v42  ;;  %v505_v63 = vcvt.f32.s32 %v2410_v42 }
 0x18c   : > { %v486_v4 = vsel %vm485_vm8, %v481_v2, inf  ;;  %v501_v58 = vsel %vm500_vm9, %v496_v8, inf  ;;  %v890_v8 = vcvt.s32.f32 %v888_v26  ;;  %v581_v26 = vshll.u32 %v580_v40, 16 }
 0x18d   : > { %759 = vmin.xlane.f32.xlu1 %v758_v52  ;;  %487 = vmin.xlane.f32.xlu0 %v486_v4 }
 0x18e   : > { %v2420_v51 = vpop.xlane.xlu1 %832  ;;  %v2422_v9 = vpop.xlane.xlu0 %817 }
 0x18f   : > { %vm819_vm10 = vcmp.eq.f32.partialorder %v2268_v7, %v2422_v9  ;;  %vm834_vm11 = vcmp.eq.f32.partialorder %v2266_v5, %v2420_v51 }
 0x190   : > { %v820_v23 = vsel %vm819_vm10, %v815_v14, inf  ;;  %v835_v7 = vsel %vm834_vm11, %v830_v25, inf  ;;  %v875_v14 = vcvt.s32.f32 %v873_v44 }
 0x191   : > { %502 = vmin.xlane.f32.xlu1 %v501_v58  ;;  %821 = vmin.xlane.f32.xlu0 %v820_v23 }
 0x192   : > { %v2430_v57 = vpop.xlane.xlu1 %528  ;;  %v2432_v59 = vpop.xlane.xlu0 %513 }
 0x193   : > { %vm515_vm12 = vcmp.eq.f32.partialorder %v2288_v20, %v2432_v59  ;;  %vm530_vm13 = vcmp.eq.f32.partialorder %v2286_v18, %v2430_v57  ;;  %v520_v42 = vcvt.f32.s32 %v2432_v59 }
 0x194   : > { %v516_v31 = vsel %vm515_vm12, %v511_v22, inf  ;;  %v531_v20 = vsel %vm530_vm13, %v526_v48, inf  ;;  %v672_v22 = vcvt.f32.s32 %v2365_v24 }
 0x195   : > { %836 = vmin.xlane.f32.xlu1 %v835_v7  ;;  %517 = vmin.xlane.f32.xlu0 %v516_v31  ;;  %v717_v7 = vcvt.f32.s32 %v2382_v3 }
 0x196   : > { %v2440_v5 = vpop.xlane.xlu1 %862  ;;  %v2442_v33 = vpop.xlane.xlu0 %740 }
 0x197   : > { %vm742_vm14 = vcmp.eq.f32.partialorder %v2308_v36, %v2442_v33  ;;  %vm864_vm15 = vcmp.eq.f32.partialorder %v2306_v34, %v2440_v5  ;;  %v718_v3 = vshll.u32 %v717_v7, 16  ;;  %v747_v55 = vcvt.f32.s32 %v2442_v33 }
 0x198   : > { %v743_v30 = vsel %vm742_vm14, %v738_v54, inf  ;;  %v865_v36 = vsel %vm864_vm15, %v860_v41, inf  ;;  %v673_v54 = vshll.u32 %v672_v22, 16 }
 0x199   : > { %532 = vmin.xlane.f32.xlu1 %v531_v20  ;;  %744 = vmin.xlane.f32.xlu0 %v743_v30  ;;  %v688_v20 = vshll.u32 %v687_v1, 16  ;;  %v762_v30 = vcvt.f32.s32 %v2400_v29  ;;  %v824_v29 = vcvt.f32.s32 %v2422_v9  ;;  %v775_v9 = vsub.s32 1, %v2500_v28 }
 0x19a   : > { %v2450_v18 = vpop.xlane.xlu1 %558  ;;  %v2452_v37 = vpop.xlane.xlu0 %847 }
 0x19b   : > { %vm849_vm1 = vcmp.eq.f32.partialorder %v2328_v53, %v2452_v37  ;;  %vm560_vm2 = vcmp.eq.f32.partialorder %v2326_v49, %v2450_v18  ;;  %v2504_v38 = vshll.u32 %v762_v30, 16 }
 0x19c   : > { %v850_v6 = vsel %vm849_vm1, %v845_v32, inf  ;;  %v561_v53 = vsel %vm560_vm2, %v556_v35, inf  ;;  %v839_v32 = vcvt.f32.s32 %v2420_v51  ;;  %v535_v35 = vcvt.f32.s32 %v2430_v57 }
 0x19d   : > { %866 = vmin.xlane.f32.xlu1 %v865_v36  ;;  %851 = vmin.xlane.f32.xlu0 %v850_v6  ;;  %v596_v6 = vshll.u32 %v595_v0, 16  ;;  %v506_v51 = vshll.u32 %v505_v63, 16  ;;  %v2511_v57 = vshll.u32 %v824_v29, 16 }
 0x19e   : > { %v2460_v34 = vpop.xlane.xlu1 %892  ;;  %v2462_v2 = vpop.xlane.xlu0 %543  ;;  %v2513_v60 = vshll.u32 %v535_v35, 16  ;;  %v748_v35 = vshll.u32 %v747_v55, 16 }
 0x19f   : > { %vm545_vm3 = vcmp.eq.f32.partialorder %v2345_v62, %v2462_v2  ;;  %vm894_vm5 = vcmp.eq.f32.partialorder %v2343_v19, %v2460_v34  ;;  %v968_v62 = vld [vmem:[%s3014_s2] sm:$0xff] }
 0x1a0   : > { %v546_v52 = vsel %vm545_vm3, %v541_v46, inf  ;;  %1855 = vmatprep.subr.mxu1 %v968_v62  ;;  %1817 = vmatprep.subr.mxu0 %v968_v62  ;;  %v895_v19 = vsel %vm894_vm5, %v890_v8, inf }
 0x1a1   : > { %562 = vmin.xlane.f32.xlu1 %v561_v53  ;;  %547 = vmin.xlane.f32.xlu0 %v546_v52  ;;  %v608_v53 = vsub.s32 0, %v2500_v28  ;;  %v2508_v52 = vshll.u32 %v839_v32, 16  ;;  %v1974_v32 = vmov 0.0  }
 0x1a2   : > { %v2470_v49 = vpop.xlane.xlu1 %922  ;;  %v2472_v4 = vpop.xlane.xlu0 %877  ;;  %1856 = vmatpush3.msra.mxu1 %v968_v62  ;;  %1818 = vmatpush3.msra.mxu0 %v968_v62 }
 0x1a3   : > { %vm879_vm6 = vcmp.eq.f32.partialorder %v2356_v47, %v2472_v4  ;;  %vm924_vm7 = vcmp.eq.f32.partialorder %v2354_v12, %v2470_v49  ;;  %v702_v12 = vcvt.f32.s32 %v2380_v61  ;;  %v490_v61 = vcvt.f32.s32 %v2412_v50 }
 0x1a4   : > { %v880_v45 = vsel %vm879_vm6, %v875_v14, inf  ;;  %v925_v58 = vsel %vm924_vm7, %v920_v10, inf  ;;  %v869_v10 = vcvt.f32.s32 %v2440_v5 }
 0x1a5   : > { %896 = vmin.xlane.f32.xlu1 %v895_v19  ;;  %881 = vmin.xlane.f32.xlu0 %v880_v45  ;;  %v703_v41 = vshll.u32 %v702_v12, 16  ;;  %v491_v44 = vshll.u32 %v490_v61, 16  ;;  %v2518_v19 = vld [vmem:[%s3016_s4] sm:$0x7]  ;;  %v2520_v45 = vshll.u32 %v520_v42, 16  ;;  %v565_v42 = vcvt.f32.s32 %v2450_v18 }
 0x1a6   : > { %v2483_v39 = vpop.xlane.xlu0 %907  ;;  %v2524_v22 = vrot.slane %v2518_v19, %v608_v53 }
 0x1a7   : > { %vm909_vm8 = vcmp.eq.f32.partialorder %v2361_v17, %v2483_v39  ;;  %v732_v17 = vcvt.f32.s32 %v2390_v21 }
 0x1a8   : > { %v910_v47 = vsel %vm909_vm8, %v905_v56, inf }
 0x1a9   : > { %926 = vmin.xlane.f32.xlu1 %v925_v58  ;;  %911 = vmin.xlane.f32.xlu0 %v910_v47  ;;  %v733_v36 = vshll.u32 %v732_v17, 16 }
 0x202   : > { %v670_v23 = vpop.xlane.xlu1 %669 }
 0x203   : > { %v671_v13 = vcvt.f32.s32 %v670_v23 }
 0x205   : > { %v674_v11 = vadd.s32 %v673_v54, %v671_v13 }
 0x206   : > { %v655_v25 = vpop.xlane.xlu0 %654 }
 0x207   : > { %v656_v24 = vcvt.f32.s32 %v655_v25  ;;  %v766_v1 = vand.u32 7, %v674_v11 }
 0x209   : > { %v659_v50 = vadd.s32 %v658_v15, %v656_v24  ;;  %v2530_v15 = vshll.u32 %v869_v10, 16 }
 0x20a   : > { %v700_v31 = vpop.xlane.xlu1 %699  ;;  %v685_v48 = vpop.xlane.xlu0 %684 }
 0x20b   : > { %v686_v46 = vcvt.f32.s32 %v685_v48  ;;  %v701_v8 = vcvt.f32.s32 %v700_v31  ;;  %v765_v56 = vand.u32 7, %v659_v50  ;;  %v2528_v48 = vrot.slane %v2518_v19, %v775_v9 }
 0x20d   : > { %v689_v58 = vadd.s32 %v688_v20, %v686_v46  ;;  %v704_v12 = vadd.s32 %v703_v41, %v701_v8  ;;  %vm2533_vm9 = vcmp.eq.s32.totalorder %v765_v56, %v2528_v48  ;;  %vm2541_vm12 = vcmp.eq.s32.totalorder %v766_v1, %v2528_v48 }
 0x20e   : > { %v730_v27 = vpop.xlane.xlu1 %729  ;;  %v715_v21 = vpop.xlane.xlu0 %714  ;;  %v1702_v46 = vsel %vm2533_vm9, 1.0, %v1974_v32  ;;  %v1703_v8 = vsel %vm2541_vm12, 1.0, %v1974_v32  ;;  %v942_v56 = vsub.s32 2, %v2500_v28 }
 0x20f   : > { %v716_v47 = vcvt.f32.s32 %v715_v21  ;;  %v731_v54 = vcvt.f32.s32 %v730_v27  ;;  %v767_v20 = vand.u32 7, %v689_v58  ;;  %v768_v41 = vand.u32 7, %v704_v12 }
 0x210   : > { %v566_v58 = vshll.u32 %v565_v42, 16 }
 0x211   : > { %v719_v33 = vadd.s32 %v718_v3, %v716_v47  ;;  %v734_v21 = vadd.s32 %v733_v36, %v731_v54  ;;  %vm779_vm14 = vcmp.eq.s32.totalorder %v767_v20, %v2528_v48  ;;  %vm2561_vm15 = vcmp.eq.s32.totalorder %v768_v41, %v2528_v48 }
 0x212   : > { %v593_v14 = vpop.xlane.xlu1 %592  ;;  %v578_v43 = vpop.xlane.xlu0 %577  ;;  %v1704_v10 = vsel %vm779_vm14, 1.0, %v1974_v32  ;;  %v1705_v1 = vsel %vm2561_vm15, 1.0, %v1974_v32 }
 0x213   : > { %v594_v59 = vcvt.f32.s32 %v593_v14  ;;  %v579_v62 = vcvt.f32.s32 %v578_v43 }
 0x215   : > { %v597_v23 = vadd.s32 %v596_v6, %v594_v59  ;;  %v582_v25 = vadd.s32 %v581_v26, %v579_v62  ;;  %v769_v26 = vand.u32 7, %v719_v33 }
 0x216   : > { %v760_v7 = vpop.xlane.xlu1 %759  ;;  %v488_v31 = vpop.xlane.xlu0 %487 }
 0x217   : > { %v605_v17 = vand.u32 7, %v597_v23  ;;  %v604_v5 = vand.u32 7, %v582_v25  ;;  %v489_v0 = vcvt.f32.s32 %v488_v31  ;;  %v761_v40 = vcvt.f32.s32 %v760_v7 }
 0x218   : > { %vm781_vm2 = vcmp.eq.s32.totalorder %v769_v26, %v2528_v48  ;;  %v550_v31 = vcvt.f32.s32 %v2462_v2 }
 0x219   : > { %v492_v24 = vadd.s32 %v491_v44, %v489_v0  ;;  %vm616_vm10 = vcmp.eq.s32.totalorder %v604_v5, %v2524_v22  ;;  %vm617_vm11 = vcmp.eq.s32.totalorder %v605_v17, %v2524_v22  ;;  %v764_v36 = vadd.s32 %v2504_v38, %v761_v40  ;;  %v2688_v40 = vld [vmem:[%s2069_s17 + $0x8] sm:$0xff] }
 0x21a   : > { %v503_v63 = vpop.xlane.xlu1 %502  ;;  %v822_v61 = vpop.xlane.xlu0 %821  ;;  %v1700_v13 = vsel %vm616_vm10, 1.0, %v1974_v32  ;;  %v1701_v29 = vsel %vm617_vm11, 1.0, %v1974_v32  ;;  %v854_v38 = vcvt.f32.s32 %v2452_v37  ;;  %v2586_v17 = vrot.slane %v2518_v19, %v942_v56 }
 0x21b   : > { %v598_v6 = vand.u32 7, %v492_v24  ;;  %v504_v3 = vcvt.f32.s32 %v503_v63  ;;  %1828 = vmatprep.mubr.msk.f32.mxu1 %vm477_vm4, %v1700_v13  ;;  %v823_v50 = vcvt.f32.s32 %v822_v61  ;;  %v772_v23 = vand.u32 7, %v764_v36 }
 0x21c   : > { %1829 = vmatmul.mubr.msk.f32.vlgmr.msra.gmra.mxu1 %vm477_vm4, %v1701_v29  ;;  %v855_v5 = vshll.u32 %v854_v38, 16  ;;  %v899_v13 = vcvt.f32.s32 %v2460_v34  ;;  %v551_v27 = vshll.u32 %v550_v31, 16  ;;  %v929_v36 = vcvt.f32.s32 %v2470_v49 }
 0x21d   : > { %v507_v44 = vadd.s32 %v506_v51, %v504_v3  ;;  %1831 = vmatprep.mubr.msk.f32.mxu1 %vm477_vm4, %v1702_v46  ;;  %vm610_vm13 = vcmp.eq.s32.totalorder %v598_v6, %v2524_v22  ;;  %v770_v51 = vand.u32 7, %v734_v21  ;;  %v826_v62 = vadd.s32 %v2511_v57, %v823_v50 }
 0x21e   : > { %v837_v53 = vpop.xlane.xlu1 %836  ;;  %v518_v11 = vpop.xlane.xlu0 %517  ;;  %v1694_v18 = vsel %vm610_vm13, 1.0, %v1974_v32  ;;  %vm2594_vm6 = vcmp.eq.s32.totalorder %v772_v23, %v2528_v48  ;;  %v884_v21 = vcvt.f32.s32 %v2472_v4 }
 0x21f   : > { %v599_v43 = vand.u32 7, %v507_v44  ;;  %v838_v9 = vcvt.f32.s32 %v837_v53  ;;  %v519_v59 = vcvt.f32.s32 %v518_v11  ;;  %1819 = vmatprep.mubr.msk.f32.mxu0 %vm477_vm4, %v1694_v18  ;;  %vm782_vm3 = vcmp.eq.s32.totalorder %v770_v51, %v2528_v48 }
 0x220   : > { %1832 = vmatmul.mubr.msk.f32.gmra.mxu1 %vm477_vm4, %v1703_v8  ;;  %v932_v54 = vand.u32 7, %v826_v62  ;;  %v1707_v41 = vsel %vm782_vm3, 1.0, %v1974_v32  ;;  %v1709_v50 = vsel %vm2594_vm6, 1.0, %v1974_v32  ;;  %v900_v11 = vshll.u32 %v899_v13, 16 }
 0x221   : > { %vm611_vm1 = vcmp.eq.s32.totalorder %v599_v43, %v2524_v22  ;;  %v522_v47 = vadd.s32 %v2520_v45, %v519_v59  ;;  %1834 = vmatprep.mubr.msk.f32.mxu1 %vm477_vm4, %v1704_v10  ;;  %v841_v57 = vadd.s32 %v2508_v52, %v838_v9  ;;  %v1706_v52 = vsel %vm781_vm2, 1.0, %v1974_v32 }
 0x222   : > { %v1695_v37 = vsel %vm611_vm1, 1.0, %v1974_v32  ;;  %v533_v25 = vpop.xlane.xlu1 %532  ;;  %v745_v55 = vpop.xlane.xlu0 %744  ;;  %vm2603_vm7 = vcmp.eq.s32.totalorder %v932_v54, %v2586_v17  ;;  %v885_v14 = vshll.u32 %v884_v21, 16  ;;  %v914_v51 = vcvt.f32.s32 %v2483_v39 }
 0x223   : > { %v600_v12 = vand.u32 7, %v522_v47  ;;  %v534_v7 = vcvt.f32.s32 %v533_v25  ;;  %1820 = vmatmul.mubr.msk.f32.vlgmr.msra.gmra.mxu0 %vm477_vm4, %v1695_v37  ;;  %v746_v45 = vcvt.f32.s32 %v745_v55  ;;  %v933_v30 = vand.u32 7, %v841_v57 }
 0x224   : > { %1835 = vmatmul.mubr.msk.f32.gmra.mxu1 %vm477_vm4, %v1705_v1  ;;  %v1710_v53 = vsel %vm2603_vm7, 1.0, %v1974_v32  ;;  %v915_v37 = vshll.u32 %v914_v51, 16  ;;  %v2745_v51 = vadd.s32 32, %v2500_v28 }
 0x225   : > { %v537_v0 = vadd.s32 %v2513_v60, %v534_v7  ;;  %v749_v20 = vadd.s32 %v748_v35, %v746_v45  ;;  %1837 = vmatprep.mubr.msk.f32.mxu1 %vm477_vm4, %v1706_v52  ;;  %vm612_vm5 = vcmp.eq.s32.totalorder %v600_v12, %v2524_v22  ;;  %vm2616_vm10 = vcmp.eq.s32.totalorder %v933_v30, %v2586_v17 }
 0x226   : > { %v867_v33 = vpop.xlane.xlu1 %866  ;;  %v852_v24 = vpop.xlane.xlu0 %851  ;;  %v1696_v2 = vsel %vm612_vm5, 1.0, %v1974_v32  ;;  %v1711_v49 = vsel %vm2616_vm10, 1.0, %v1974_v32 }
 0x227   : > { %v601_v19 = vand.u32 7, %v537_v0  ;;  %v771_v63 = vand.u32 7, %v749_v20  ;;  %v868_v60 = vcvt.f32.s32 %v867_v33  ;;  %v853_v61 = vcvt.f32.s32 %v852_v24  ;;  %1822 = vmatprep.mubr.msk.f32.mxu0 %vm477_vm4, %v1696_v2 }
 0x228   : > { %1838 = vmatmul.mubr.msk.f32.gmra.mxu1 %vm477_vm4, %v1707_v41  ;;  %v2683_v41 = vadd.s32 8, %v2500_v28 }
 0x229   : > { %v871_v3 = vadd.s32 %v2530_v15, %v868_v60  ;;  %v856_v29 = vadd.s32 %v855_v5, %v853_v61  ;;  %vm613_vm8 = vcmp.eq.s32.totalorder %v601_v19, %v2524_v22  ;;  %vm783_vm9 = vcmp.eq.s32.totalorder %v771_v63, %v2528_v48 }
 0x22a   : > { %v563_v35 = vpop.xlane.xlu1 %562  ;;  %v1697_v34 = vsel %vm613_vm8, 1.0, %v1974_v32  ;;  %v548_v42 = vpop.xlane.xlu0 %547  ;;  %v1708_v4 = vsel %vm783_vm9, 1.0, %v1974_v32  ;;  %v2691_v60 = vstv %s1227_s13 }
 0x22b   : > { %v935_v15 = vand.u32 7, %v871_v3  ;;  %v934_v26 = vand.u32 7, %v856_v29  ;;  %v564_v44 = vcvt.f32.s32 %v563_v35  ;;  %1823 = vmatmul.mubr.msk.f32.gmra.mxu0 %vm477_vm4, %v1697_v34  ;;  %v549_v48 = vcvt.f32.s32 %v548_v42  ;;  %1840 = vmatprep.mubr.msk.f32.mxu1 %vm477_vm4, %v1708_v4  ;;  %v2714_v42 = vld [vmem:[%s2069_s17 + $0x18] sm:$0xff] }
 0x22c   : > { %1841 = vmatmul.mubr.msk.f32.gmra.mxu1 %vm477_vm4, %v1709_v50  ;;  %vm1238_vm5 = vcmp.lt.s32.totalorder %v2500_v28, %v2691_v60  ;;  %v2706_v3 = vadd.s32 24, %v2500_v28  ;;  %v2709_v29 = vadd.s32 16, %v2500_v28  ;;  %v2718_v50 = vadd.s32 48, %v2500_v28 }
 0x22d   : > { %v567_v18 = vadd.s32 %v566_v58, %v564_v44  ;;  %v552_v8 = vadd.s32 %v551_v27, %v549_v48  ;;  %1843 = vmatprep.mubr.msk.f32.mxu1 %vm477_vm4, %v1710_v53  ;;  %vm946_vm11 = vcmp.eq.s32.totalorder %v934_v26, %v2586_v17  ;;  %vm2634_vm12 = vcmp.eq.s32.totalorder %v935_v15, %v2586_v17  ;;  %v2696_v27 = vld [vmem:[%s2069_s17] sm:$0xff] }
 0x22e   : > { %v897_v43 = vpop.xlane.xlu1 %896  ;;  %v882_v9 = vpop.xlane.xlu0 %881  ;;  %v930_v58 = vshll.u32 %v929_v36, 16  ;;  %v1712_v39 = vsel %vm946_vm11, 1.0, %v1974_v32  ;;  %v1713_v12 = vsel %vm2634_vm12, 1.0, %v1974_v32  ;;  %v2725_v44 = vadd.s32 40, %v2500_v28 }
 0x22f   : > { %v603_v38 = vand.u32 7, %v567_v18  ;;  %v602_v62 = vand.u32 7, %v552_v8  ;;  %v898_v10 = vcvt.f32.s32 %v897_v43  ;;  %v883_v56 = vcvt.f32.s32 %v882_v9 }
 0x230   : > { %1844 = vmatmul.mubr.msk.f32.gmra.mxu1 %vm477_vm4, %v1711_v49  ;;  %vm1241_vm6 = vcmp.lt.s32.totalorder %v2706_v3, %v2691_v60  ;;  %vm1240_vm7 = vcmp.lt.s32.totalorder %v2709_v29, %v2691_v60  ;;  %v2750_v9 = vadd.s32 56, %v2500_v28  ;;  %vm1244_vm8 = vcmp.lt.s32.totalorder %v2718_v50, %v2691_v60 }
 0x231   : > { %v901_v47 = vadd.s32 %v900_v11, %v898_v10  ;;  %v886_v23 = vadd.s32 %v885_v14, %v883_v56  ;;  %1846 = vmatprep.mubr.msk.f32.mxu1 %vm477_vm4, %v1712_v39  ;;  %vm614_vm13 = vcmp.eq.s32.totalorder %v602_v62, %v2524_v22  ;;  %vm615_vm14 = vcmp.eq.s32.totalorder %v603_v38, %v2524_v22  ;;  %v2736_v11 = vld [vmem:[%s2069_s17 + $0x10] sm:$0xff]  ;;  %v2754_v62 = vld [vmem:[%s2069_s17 + $0x28] sm:$0xff] }
 0x232   : > { %v927_v57 = vpop.xlane.xlu1 %926  ;;  %v912_v25 = vpop.xlane.xlu0 %911  ;;  %v1698_v55 = vsel %vm614_vm13, 1.0, %v1974_v32  ;;  %v1699_v1 = vsel %vm615_vm14, 1.0, %v1974_v32  ;;  %vm1243_vm9 = vcmp.lt.s32.totalorder %v2725_v44, %v2691_v60  ;;  %vm1242_vm10 = vcmp.lt.s32.totalorder %v2745_v51, %v2691_v60 }
 0x233   : > { %v937_v7 = vand.u32 7, %v901_v47  ;;  %v936_v45 = vand.u32 7, %v886_v23  ;;  %v928_v31 = vcvt.f32.s32 %v927_v57  ;;  %v913_v54 = vcvt.f32.s32 %v912_v25  ;;  %1825 = vmatprep.mubr.msk.f32.mxu0 %vm477_vm4, %v1698_v55 }
 0x234   : > { %1826 = vmatmul.mubr.msk.f32.gmra.mxu0 %vm477_vm4, %v1699_v1  ;;  %1847 = vmatmul.mubr.msk.f32.gmra.mxu1 %vm477_vm4, %v1713_v12  ;;  %v2779_v12 = vld [vmem:[%s2069_s17 + $0x38] sm:$0xff]  ;;  %vm1245_vm11 = vcmp.lt.s32.totalorder %v2750_v9, %v2691_v60  ;;  %vm1338_vm12 = vcmp.eq.s32.totalorder %v2091_v16, 1  ;;  %vm1398_vm13 = vcmp.eq.s32.totalorder %v2091_v16, 2 }
 0x235   : > { %v931_v22 = vadd.s32 %v930_v58, %v928_v31  ;;  %v916_v52 = vadd.s32 %v915_v37, %v913_v54  ;;  %vm948_vm15 = vcmp.eq.s32.totalorder %v936_v45, %v2586_v17  ;;  %vm949_vm1 = vcmp.eq.s32.totalorder %v937_v7, %v2586_v17  ;;  %v2768_v37 = vld [vmem:[%s2069_s17 + $0x20] sm:$0xff] }
 0x236   : > { %v1714_v5 = vsel %vm948_vm15, 1.0, %v1974_v32  ;;  %v1715_v30 = vsel %vm949_vm1, 1.0, %v1974_v32 }
 0x237   : > { %v939_v0 = vand.u32 7, %v931_v22  ;;  %v938_v20 = vand.u32 7, %v916_v52  ;;  %1849 = vmatprep.mubr.msk.f32.mxu1 %vm477_vm4, %v1714_v5 }
 0x238   : > { %1850 = vmatmul.mubr.msk.f32.gmra.mxu1 %vm477_vm4, %v1715_v30 }
 0x239   : > { %vm950_vm2 = vcmp.eq.s32.totalorder %v938_v20, %v2586_v17  ;;  %vm951_vm3 = vcmp.eq.s32.totalorder %v939_v0, %v2586_v17 }
 0x23a   : > { %v1716_v33 = vsel %vm950_vm2, 1.0, %v1974_v32  ;;  %v1717_v24 = vsel %vm951_vm3, 1.0, %v1974_v32 }
 0x23b   : > { %1852 = vmatprep.mubr.msk.f32.mxu1 %vm477_vm4, %v1716_v33  ;;  %v2797_v33 = vld [vmem:[%s2069_s17 + $0x30] sm:$0xff] }
 0x23c   : > { %1853 = vmatmul.mubr.msk.f32.gmra.mxu1 %vm477_vm4, %v1717_v24  ;;  %vm1239_vm4 = vcmp.lt.s32.totalorder %v2683_v41, %v2691_v60 }
 0x2dc   : > { %v2667_v2 = vpop.f32.mrf.mxu1 }
 0x2dd   : > { %1253 = vst.msk [vmem:[%s2669_s11 + $0x38] sm:$0xff] %vm277_vm0, %v2667_v2  ;;  %v1261_v7 = vsub.f32 %v2667_v2, %v2779_v12 }
 0x2de   : > { %v2675_v32 = vpop.f32.mrf.mxu1 }
 0x2df   : > { %1252 = vst.msk [vmem:[%s2669_s11 + $0x30] sm:$0xff] %vm277_vm0, %v2675_v32  ;;  %v1260_v24 = vsub.f32 %v2675_v32, %v2797_v33 }
 0x2e0   : > { %v1833_v17 = vpop.f32.mrf.mxu1 }
 0x2e1   : > { %1744 = vst.msk [vmem:[%s2669_s11 + $0x48] sm:$0xff] %vm277_vm0, %v1833_v17  ;;  %v1331_v19 = vsub.f32 %v1833_v17, %v2688_v40 }
 0x2e2   : > { %v1147_v63 = vpop.f32.mrf.mxu1 }
 0x2e3   : > { %v1340_v61 = vmul.f32 %v1331_v19, %v1331_v19  ;;  %v1821_v13 = vpop.f32.mrf.mxu0  ;;  %1743 = vst.msk [vmem:[%s2669_s11 + $0x40] sm:$0xff] %vm277_vm0, %v1147_v63  ;;  %v1330_v21 = vsub.f32 %v1147_v63, %v2696_v27 }
 0x2e4   : > { %1247 = vst.msk [vmem:[%s2669_s11 + $0x8] sm:$0xff] %vm277_vm0, %v1821_v13  ;;  %v1836_v6 = vpop.f32.mrf.mxu1  ;;  %v1255_v46 = vsub.f32 %v1821_v13, %v2688_v40 }
 0x2e5   : > { %v1339_v35 = vmul.f32 %v1330_v21, %v1330_v21  ;;  %v1107_v34 = vpop.f32.mrf.mxu0  ;;  %1746 = vst.msk [vmem:[%s2669_s11 + $0x58] sm:$0xff] %vm277_vm0, %v1836_v6  ;;  %v1333_v4 = vsub.f32 %v1836_v6, %v2714_v42  ;;  %v1348_v48 = vsel %vm1239_vm4, %v1340_v61, 0.0 }
 0x2e6   : > { %1246 = vst.msk [vmem:[%s2669_s11] sm:$0xff] %vm277_vm0, %v1107_v34  ;;  %v1254_v15 = vsub.f32 %v1107_v34, %v2696_v27  ;;  %v1157_v26 = vpop.f32.mrf.mxu1  ;;  %v1356_v49 = vsel %vm277_vm0, %v1348_v48, 0.0  ;;  %v1264_v59 = vmul.f32 %v1255_v46, %v1255_v46 }
 0x2e7   : > { %v1347_v36 = vsel %vm1238_vm5, %v1339_v35, 0.0  ;;  %v1342_v53 = vmul.f32 %v1333_v4, %v1333_v4  ;;  %1745 = vst.msk [vmem:[%s2669_s11 + $0x50] sm:$0xff] %vm277_vm0, %v1157_v26  ;;  %v1332_v18 = vsub.f32 %v1157_v26, %v2736_v11 }
 0x2e8   : > { %v1355_v8 = vsel %vm277_vm0, %v1347_v36, 0.0  ;;  %v1839_v14 = vpop.f32.mrf.mxu1  ;;  %v1263_v38 = vmul.f32 %v1254_v15, %v1254_v15  ;;  %v1288_v2 = vsel %vm1239_vm4, %v1264_v59, 0.0 }
 0x2e9   : > { %v1341_v43 = vmul.f32 %v1332_v18, %v1332_v18  ;;  %1748 = vst.msk [vmem:[%s2669_s11 + $0x68] sm:$0xff] %vm277_vm0, %v1839_v14  ;;  %v1335_v10 = vsub.f32 %v1839_v14, %v2754_v62  ;;  %v1357_v58 = vadd.f32 %v1356_v49, %v1355_v8  ;;  %v1350_v39 = vsel %vm1241_vm6, %v1342_v53, 0.0 }
 0x2ea   : > { %v1167_v56 = vpop.f32.mrf.mxu1  ;;  %v1287_v52 = vsel %vm1238_vm5, %v1263_v38, 0.0  ;;  %v1360_v5 = vsel %vm277_vm0, %v1350_v39, 0.0  ;;  %v1296_v46 = vsel %vm277_vm0, %v1288_v2, 0.0  ;;  %v1270_v14 = vmul.f32 %v1261_v7, %v1261_v7 }
 0x2eb   : > { %v1349_v47 = vsel %vm1240_vm7, %v1341_v43, 0.0  ;;  %v1824_v23 = vpop.f32.mrf.mxu0  ;;  %1747 = vst.msk [vmem:[%s2669_s11 + $0x60] sm:$0xff] %vm277_vm0, %v1167_v56  ;;  %v1334_v57 = vsub.f32 %v1167_v56, %v2768_v37  ;;  %v1344_v55 = vmul.f32 %v1335_v10, %v1335_v10  ;;  %v1295_v6 = vsel %vm277_vm0, %v1287_v52, 0.0 }
 0x2ec   : > { %v1358_v25 = vsel %vm277_vm0, %v1349_v47, 0.0  ;;  %1249 = vst.msk [vmem:[%s2669_s11 + $0x18] sm:$0xff] %vm277_vm0, %v1824_v23  ;;  %v1842_v1 = vpop.f32.mrf.mxu1  ;;  %v1257_v31 = vsub.f32 %v1824_v23, %v2714_v42  ;;  %v1297_v43 = vadd.f32 %v1296_v46, %v1295_v6  ;;  %v1269_v7 = vmul.f32 %v1260_v24, %v1260_v24 }
 0x2ed   : > { %v1359_v45 = vadd.f32 %v1358_v25, %v1357_v58  ;;  %v1343_v54 = vmul.f32 %v1334_v57, %v1334_v57  ;;  %v1117_v22 = vpop.f32.mrf.mxu0  ;;  %1750 = vst.msk [vmem:[%s2669_s11 + $0x78] sm:$0xff] %vm277_vm0, %v1842_v1  ;;  %v1337_v20 = vsub.f32 %v1842_v1, %v2779_v12  ;;  %v1352_v63 = vsel %vm1243_vm9, %v1344_v55, 0.0 }
 0x2ee   : > { %1248 = vst.msk [vmem:[%s2669_s11 + $0x10] sm:$0xff] %vm277_vm0, %v1117_v22  ;;  %v1256_v0 = vsub.f32 %v1117_v22, %v2736_v11  ;;  %v1177_v30 = vpop.f32.mrf.mxu1  ;;  %v1266_v35 = vmul.f32 %v1257_v31, %v1257_v31  ;;  %v1364_v53 = vsel %vm277_vm0, %v1352_v63, 0.0  ;;  %v1293_v3 = vsel %vm1244_vm8, %v1269_v7, 0.0 }
 0x2ef   : > { %v1351_v17 = vsel %vm1242_vm10, %v1343_v54, 0.0  ;;  %v1361_v19 = vadd.f32 %v1360_v5, %v1359_v45  ;;  %1749 = vst.msk [vmem:[%s2669_s11 + $0x70] sm:$0xff] %vm277_vm0, %v1177_v30  ;;  %v1336_v32 = vsub.f32 %v1177_v30, %v2797_v33  ;;  %v1346_v26 = vmul.f32 %v1337_v20, %v1337_v20 }
 0x2f0   : > { %v1362_v61 = vsel %vm277_vm0, %v1351_v17, 0.0  ;;  %v1265_v13 = vmul.f32 %v1256_v0, %v1256_v0  ;;  %v1845_v21 = vpop.f32.mrf.mxu1  ;;  %v1290_v56 = vsel %vm1241_vm6, %v1266_v35, 0.0 }
 0x2f1   : > { %v1363_v34 = vadd.f32 %v1362_v61, %v1361_v19  ;;  %1752 = vst.msk [vmem:[%s2669_s11 + $0x88] sm:$0xff] %vm277_vm0, %v1845_v21  ;;  %v1391_v4 = vsub.f32 %v1845_v21, %v2688_v40  ;;  %v1345_v48 = vmul.f32 %v1336_v32, %v1336_v32  ;;  %v1354_v55 = vsel %vm1245_vm11, %v1346_v26, 0.0 }
 0x2f2   : > { %v1289_v15 = vsel %vm1240_vm7, %v1265_v13, 0.0  ;;  %v1187_v36 = vpop.f32.mrf.mxu1  ;;  %v1300_v0 = vsel %vm277_vm0, %v1290_v56, 0.0  ;;  %v1368_v30 = vsel %vm277_vm0, %v1354_v55, 0.0 }
 0x2f3   : > { %v1298_v18 = vsel %vm277_vm0, %v1289_v15, 0.0  ;;  %v1400_v8 = vmul.f32 %v1391_v4, %v1391_v4  ;;  %1751 = vst.msk [vmem:[%s2669_s11 + $0x80] sm:$0xff] %vm277_vm0, %v1187_v36  ;;  %v1390_v40 = vsub.f32 %v1187_v36, %v2696_v27  ;;  %v1353_v49 = vsel %vm1244_vm8, %v1345_v48, 0.0 }
 0x2f4   : > { %v1827_v59 = vpop.f32.mrf.mxu0  ;;  %v1848_v38 = vpop.f32.mrf.mxu1  ;;  %v1365_v10 = vadd.f32 %v1364_v53, %v1363_v34  ;;  %v1299_v47 = vadd.f32 %v1298_v18, %v1297_v43  ;;  %v1366_v1 = vsel %vm277_vm0, %v1353_v49, 0.0  ;;  %v1294_v36 = vsel %vm1245_vm11, %v1270_v14, 0.0 }
 0x2f5   : > { %v1399_v58 = vmul.f32 %v1390_v40, %v1390_v40  ;;  %1251 = vst.msk [vmem:[%s2669_s11 + $0x28] sm:$0xff] %vm277_vm0, %v1827_v59  ;;  %v1259_v27 = vsub.f32 %v1827_v59, %v2754_v62  ;;  %1754 = vst.msk [vmem:[%s2669_s11 + $0x98] sm:$0xff] %vm277_vm0, %v1848_v38  ;;  %v1393_v39 = vsub.f32 %v1848_v38, %v2714_v42  ;;  %v1408_v23 = vsel %vm1239_vm4, %v1400_v8, 0.0 }
 0x2f6   : > { %v1127_v57 = vpop.f32.mrf.mxu0  ;;  %v1197_v25 = vpop.f32.mrf.mxu1  ;;  %v1367_v5 = vadd.f32 %v1366_v1, %v1365_v10  ;;  %v1416_v28 = vsel %vm277_vm0, %v1408_v23, 0.0  ;;  %v1301_v2 = vadd.f32 %v1300_v0, %v1299_v47  ;;  %v1306_v38 = vsel %vm277_vm0, %v1293_v3, 0.0  ;;  %v1551_v3 = vld [vmem:[%s2669_s11 + $0x50] sm:$0xff] (%p2049_p5) }
 0x2f7   : > { %v1407_v45 = vsel %vm1238_vm5, %v1399_v58, 0.0  ;;  %v1268_v42 = vmul.f32 %v1259_v27, %v1259_v27  ;;  %1250 = vst.msk [vmem:[%s2669_s11 + $0x20] sm:$0xff] %vm277_vm0, %v1127_v57  ;;  %v1258_v41 = vsub.f32 %v1127_v57, %v2768_v37  ;;  %1753 = vst.msk [vmem:[%s2669_s11 + $0x90] sm:$0xff] %vm277_vm0, %v1197_v25  ;;  %v1402_v54 = vmul.f32 %v1393_v39, %v1393_v39 }
 0x2f8   : > { %v1415_v31 = vsel %vm277_vm0, %v1407_v45, 0.0  ;;  %v1392_v22 = vsub.f32 %v1197_v25, %v2736_v11  ;;  %v1851_v52 = vpop.f32.mrf.mxu1  ;;  %v1369_v13 = vadd.f32 %v1368_v30, %v1367_v5  ;;  %v1308_v58 = vsel %vm277_vm0, %v1294_v36, 0.0  ;;  %1552 = vst [vmem:[%s2926_s28 + $0x90] sm:$0xff] (%p2049_p5), %v1551_v3  ;;  %v1559_v36 = vld [vmem:[%s2669_s11 + $0x70] sm:$0xff] (%p2049_p5) }
 0x2f9   : > { %v1267_v20 = vmul.f32 %v1258_v41, %v1258_v41  ;;  %1756 = vst.msk [vmem:[%s2669_s11 + $0xa8] sm:$0xff] %vm277_vm0, %v1851_v52  ;;  %v1417_v24 = vadd.f32 %v1416_v28, %v1415_v31  ;;  %v1395_v19 = vsub.f32 %v1851_v52, %v2754_v62  ;;  %v1292_v11 = vsel %vm1243_vm9, %v1268_v42, 0.0  ;;  %1560 = vst [vmem:[%s2926_s28 + $0xb0] sm:$0xff] (%p2049_p5), %v1559_v36 }
 0x2fa   : > { %v1401_v17 = vmul.f32 %v1392_v22, %v1392_v22  ;;  %v1207_v63 = vpop.f32.mrf.mxu1  ;;  %v1410_v21 = vsel %vm1241_vm6, %v1402_v54, 0.0  ;;  %1370 = vadd.xlane.f32.xlu1 %v1369_v13  ;;  %v1304_v26 = vsel %vm277_vm0, %v1292_v11, 0.0 }
 0x2fb   : > { %v1291_v61 = vsel %vm1242_vm10, %v1267_v20, 0.0  ;;  %1755 = vst.msk [vmem:[%s2669_s11 + $0xa0] sm:$0xff] %vm277_vm0, %v1207_v63  ;;  %v1394_v32 = vsub.f32 %v1207_v63, %v2768_v37  ;;  %v1404_v35 = vmul.f32 %v1395_v19, %v1395_v19  ;;  %v1420_v53 = vsel %vm277_vm0, %v1410_v21, 0.0  ;;  %v1533_v21 = vld [vmem:[%s2669_s11 + $0x8] sm:$0xff] (%p2049_p5) }
 0x2fc   : > { %v1302_v62 = vsel %vm277_vm0, %v1291_v61, 0.0  ;;  %v1409_v6 = vsel %vm1240_vm7, %v1401_v17, 0.0  ;;  %v1854_v34 = vpop.f32.mrf.mxu1  ;;  %1534 = vst [vmem:[%s2926_s28 + $0x8] sm:$0xff] (%p2049_p5), %v1533_v21 }
 0x2fd   : > { %v1303_v4 = vadd.f32 %v1302_v62, %v1301_v2  ;;  %v1418_v46 = vsel %vm277_vm0, %v1409_v6, 0.0  ;;  %v1403_v15 = vmul.f32 %v1394_v32, %v1394_v32  ;;  %1758 = vst.msk [vmem:[%s2669_s11 + $0xb8] sm:$0xff] %vm277_vm0, %v1854_v34  ;;  %v1397_v37 = vsub.f32 %v1854_v34, %v2779_v12  ;;  %v1535_v62 = vld [vmem:[%s2669_s11 + $0x10] sm:$0xff] (%p2049_p5)  ;;  %v1537_v6 = vld [vmem:[%s2669_s11 + $0x18] sm:$0xff] (%p2049_p5)  ;;  %v1541_v34 = vld [vmem:[%s2669_s11 + $0x28] sm:$0xff] (%p2049_p5) }
 0x2fe   : > { %v1419_v29 = vadd.f32 %v1418_v46, %v1417_v24  ;;  %v1217_v48 = vpop.f32.mrf.mxu1  ;;  %v1412_v18 = vsel %vm1243_vm9, %v1404_v35, 0.0  ;;  %1536 = vst [vmem:[%s2926_s28 + $0x10] sm:$0xff] (%p2049_p5), %v1535_v62  ;;  %v1539_v35 = vld [vmem:[%s2669_s11 + $0x20] sm:$0xff] (%p2049_p5)  ;;  %1538 = vst [vmem:[%s2926_s28 + $0x18] sm:$0xff] (%p2049_p5), %v1537_v6  ;;  %v1545_v46 = vld [vmem:[%s2669_s11 + $0x38] sm:$0xff] (%p2049_p5) }
 0x2ff   : > { %v1411_v12 = vsel %vm1242_vm10, %v1403_v15, 0.0  ;;  %1757 = vst.msk [vmem:[%s2669_s11 + $0xb0] sm:$0xff] %vm277_vm0, %v1217_v48  ;;  %v1396_v8 = vsub.f32 %v1217_v48, %v2797_v33  ;;  %v1406_v49 = vmul.f32 %v1397_v37, %v1397_v37  ;;  %v1305_v59 = vadd.f32 %v1304_v26, %v1303_v4  ;;  %1540 = vst [vmem:[%s2926_s28 + $0x20] sm:$0xff] (%p2049_p5), %v1539_v35  ;;  %v1543_v4 = vld [vmem:[%s2669_s11 + $0x30] sm:$0xff] (%p2049_p5)  ;;  %v1547_v15 = vld [vmem:[%s2669_s11 + $0x40] sm:$0xff] (%p2049_p5) }
 0x300   : > { %v1421_v40 = vadd.f32 %v1420_v53, %v1419_v29  ;;  %v1422_v43 = vsel %vm277_vm0, %v1411_v12, 0.0  ;;  %v1424_v44 = vsel %vm277_vm0, %v1412_v18, 0.0  ;;  %1542 = vst [vmem:[%s2926_s28 + $0x28] sm:$0xff] (%p2049_p5), %v1541_v34  ;;  %1544 = vst [vmem:[%s2926_s28 + $0x30] sm:$0xff] (%p2049_p5), %v1543_v4  ;;  %v1549_v37 = vld [vmem:[%s2669_s11 + $0x48] sm:$0xff] (%p2049_p5)  ;;  %v1553_v26 = vld [vmem:[%s2669_s11 + $0x58] sm:$0xff] (%p2049_p5) }
 0x301   : > { %v1405_v14 = vmul.f32 %v1396_v8, %v1396_v8  ;;  %v1307_v56 = vadd.f32 %v1306_v38, %v1305_v59  ;;  %v1414_v39 = vsel %vm1245_vm11, %v1406_v49, 0.0  ;;  %1546 = vst [vmem:[%s2926_s28 + $0x38] sm:$0xff] (%p2049_p5), %v1545_v46  ;;  %1548 = vst [vmem:[%s2926_s28 + $0x80] sm:$0xff] (%p2049_p5), %v1547_v15  ;;  %v1555_v29 = vld [vmem:[%s2669_s11 + $0x60] sm:$0xff] (%p2049_p5)  ;;  %v1557_v48 = vld [vmem:[%s2669_s11 + $0x68] sm:$0xff] (%p2049_p5) }
 0x302   : > { %v1423_v10 = vadd.f32 %v1422_v43, %v1421_v40  ;;  %v1428_v57 = vsel %vm277_vm0, %v1414_v39, 0.0  ;;  %1550 = vst [vmem:[%s2926_s28 + $0x88] sm:$0xff] (%p2049_p5), %v1549_v37  ;;  %1554 = vst [vmem:[%s2926_s28 + $0x98] sm:$0xff] (%p2049_p5), %v1553_v26  ;;  %v1561_v53 = vld [vmem:[%s2669_s11 + $0x78] sm:$0xff] (%p2049_p5)  ;;  %v1563_v18 = vld [vmem:[%s2669_s11 + $0x80] sm:$0xff] (%p2049_p5) }
 0x303   : > { %v1413_v51 = vsel %vm1244_vm8, %v1405_v14, 0.0  ;;  %v1309_v27 = vadd.f32 %v1308_v58, %v1307_v56  ;;  %1556 = vst [vmem:[%s2926_s28 + $0xa0] sm:$0xff] (%p2049_p5), %v1555_v29  ;;  %1558 = vst [vmem:[%s2926_s28 + $0xa8] sm:$0xff] (%p2049_p5), %v1557_v48  ;;  %v1565_v12 = vld [vmem:[%s2669_s11 + $0x88] sm:$0xff] (%p2049_p5)  ;;  %v1567_v8 = vld [vmem:[%s2669_s11 + $0x90] sm:$0xff] (%p2049_p5) }
 0x304   : > { %v1426_v33 = vsel %vm277_vm0, %v1413_v51, 0.0  ;;  %v1425_v47 = vadd.f32 %v1424_v44, %v1423_v10  ;;  %vm1262_vm0 = vcmp.eq.s32.totalorder %v2091_v16, 0  ;;  %v1531_v16 = vld [vmem:[%s2669_s11] sm:$0xff] (%p2049_p5)  ;;  %1562 = vst [vmem:[%s2926_s28 + $0xb8] sm:$0xff] (%p2049_p5), %v1561_v53  ;;  %1564 = vst [vmem:[%s2926_s28 + $0x100] sm:$0xff] (%p2049_p5), %v1563_v18  ;;  %v1569_v40 = vld [vmem:[%s2669_s11 + $0x98] sm:$0xff] (%p2049_p5) }
 0x305   : > { %1310 = vadd.xlane.f32.xlu0 %v1309_v27  ;;  %1532 = vst [vmem:[%s2926_s28] sm:$0xff] (%p2049_p5), %v1531_v16  ;;  %1566 = vst [vmem:[%s2926_s28 + $0x108] sm:$0xff] (%p2049_p5), %v1565_v12  ;;  %v1571_v43 = vld [vmem:[%s2669_s11 + $0xa0] sm:$0xff] (%p2049_p5)  ;;  %v1573_v49 = vld [vmem:[%s2669_s11 + $0xa8] sm:$0xff] (%p2049_p5) }
 0x306   : > { %v1427_v23 = vadd.f32 %v1426_v33, %v1425_v47  ;;  %1568 = vst [vmem:[%s2926_s28 + $0x110] sm:$0xff] (%p2049_p5), %v1567_v8  ;;  %1570 = vst [vmem:[%s2926_s28 + $0x118] sm:$0xff] (%p2049_p5), %v1569_v40  ;;  %v1575_v59 = vld [vmem:[%s2669_s11 + $0xb0] sm:$0xff] (%p2049_p5)  ;;  %v1577_v14 = vld [vmem:[%s2669_s11 + $0xb8] sm:$0xff] (%p2049_p5) }
 0x307   : > { %1572 = vst [vmem:[%s2926_s28 + $0x120] sm:$0xff] (%p2049_p5), %v1571_v43  ;;  %1574 = vst [vmem:[%s2926_s28 + $0x128] sm:$0xff] (%p2049_p5), %v1573_v49 }
 0x308   : > { %v1429_v25 = vadd.f32 %v1428_v57, %v1427_v23  ;;  %1576 = vst [vmem:[%s2926_s28 + $0x130] sm:$0xff] (%p2049_p5), %v1575_v59  ;;  %1578 = vst [vmem:[%s2926_s28 + $0x138] sm:$0xff] (%p2049_p5), %v1577_v14 }
 0x30a   : > { %1430 = vadd.xlane.f32.xlu0 %v1429_v25 }
 0x383   : > { %v1371_v55 = vpop.xlane.xlu1 %1370 }
 0x384   : > { %v1372_v1 = vrot.slane %v1371_v55, 4 }
 0x386   : > { %v1373_v50 = vadd.f32 %v1372_v1, %v1371_v55 }
 0x388   : > { %v1374_v7 = vrot.slane %v1373_v50, 2 }
 0x38a   : > { %v1375_v31 = vadd.f32 %v1374_v7, %v1373_v50 }
 0x38c   : > { %v1376_v5 = vrot.slane %v1375_v31, 1 }
 0x38e   : > { %v1311_v45 = vpop.xlane.xlu0 %1310  ;;  %v1377_v24 = vadd.f32 %v1376_v5, %v1375_v31 }
 0x38f   : > { %v1312_v42 = vrot.slane %v1311_v45, 4 }
 0x391   : > { %v1313_v41 = vadd.f32 %v1312_v42, %v1311_v45 }
 0x393   : > { %v1431_v54 = vpop.xlane.xlu0 %1430  ;;  %v1314_v22 = vrot.slane %v1313_v41, 2 }
 0x394   : > { %v1432_v52 = vrot.slane %v1431_v54, 4 }
 0x395   : > { %v1315_v9 = vadd.f32 %v1314_v22, %v1313_v41 }
 0x396   : > { %v1433_v60 = vadd.f32 %v1432_v52, %v1431_v54 }
 0x397   : > { %v1316_v28 = vrot.slane %v1315_v9, 1 }
 0x398   : > { %v1434_v0 = vrot.slane %v1433_v60, 2 }
 0x399   : > { %v1317_v30 = vadd.f32 %v1316_v28, %v1315_v9 }
 0x39a   : > { %v1435_v20 = vadd.f32 %v1434_v0, %v1433_v60 }
 0x39b   : > { %1858 = vpush %v1317_v30 }
 0x39c   : > { %v1436_v2 = vrot.slane %v1435_v20, 1  ;;  %1860 = vpush %v1377_v24 }
 0x39e   : > { %v1437_v17 = vadd.f32 %v1436_v2, %v1435_v20 }
 0x3a0   : > { %1862 = vpush %v1437_v17 }
 0x3cc   : > { %s1859_s14 = spop %1858 }
 0x3cd   : > { %v1319_v19 = vstv %s1859_s14  ;;  %s1861_s15 = spop %1860 }
 0x3ce   : > { %v1320_v63 = vsel %vm1262_vm0, %v1319_v19, 0.0  ;;  %v1379_v11 = vstv %s1861_s15 }
 0x3cf   : > { %v1380_v61 = vsel %vm1338_vm12, %v1379_v11, %v1320_v63 }
 0x3d0   : > { %1453 = sbr.rel (!%p2049_p5) target bundleno = 981 (0x3d5), region = 44 }
 0x3d1   : > { %s1863_s17 = spop %1862 }
 0x3d2   : > { %v1439_v13 = vstv %s1863_s17 }
 0x3d3   : > { %v1440_v32 = vsel %vm1398_vm13, %v1439_v13, %v1380_v61 }
 0x3d4   : > { %1441 = vst [vmem:[%s2915_s18] sm:$0xff] %v1440_v32 }
 0x3d5 PF: > { %s1762_s29 = sshll.u32 %s2032_s25, 7  ;;  %s1591_s10 = sshll.u32 %s2915_s18, 4  ;;  %s1592_s10 = int_to_ptr.vmem [resolvable:$true] %s1591_s10 }
 0x3d6   : > { %s1589_s14 = scalar_lea.hbm %s3018_s6, %s1762_s29  ;;  %s1912_s15 = scalar_lea.vmem %s1592_s10, 128 }
 0x3d7   : > { %p1913_p11 = scmp.ne.s32.totalorder %s1592_s10, %s1912_s15  ;;  %s1975_s11 = smov [#allocation3]  }
 0x3d8   : > { %s1916_s16 = sshll.u32 %s1975_s11, 4  ;;  %s1917_s16 = int_to_ptr.vmem [resolvable:$false] %s1916_s16 }
 0x3d9   : > { %p1914_p12 = pnand %p1913_p11, %p2049_p5  ;;  %s1918_s17 = scalar_lea.vmem %s1917_s16, 256 }
 0x3da   : > { %p1919_p0 = scmp.lt.s32.totalorder %s1592_s10, %s1917_s16  ;;  %p1920_p1 = scmp.lt.s32.totalorder %s1918_s17, %s1912_s15 }
 0x3db   : > { %p1915_p13 = pneg %p1914_p12 }
 0x3dc   : > { %p1921_p2 = por %p1920_p1, %p1919_p0 }
 0x3de   : > { %p1922_p3 = pnand %p1921_p2, %p1915_p13 }
 0x3e0   : > { %1925 = shalt.err (!%p1922_p3)
}
 0x3e1   : > { %s1926_s25 = scalar_lea.hbm %s1589_s14, 128  ;;  %s1930_s26 = scalar_lea.hbm %s3018_s6, 256 }
 0x3e2   : > { %p1927_p4 = scmp.ne.s32.totalorder %s1589_s14, %s1926_s25  ;;  %p1931_p9 = scmp.lt.s32.totalorder %s1589_s14, %s3018_s6 }
 0x3e3   : > { %p1932_p10 = scmp.lt.s32.totalorder %s1930_s26, %s1926_s25 }
 0x3e4   : > { %p1928_p7 = pnand %p1927_p4, %p2049_p5 }
 0x3e5   : > { %p1933_p11 = por %p1932_p10, %p1931_p9 }
 0x3e6   : > { %p1929_p8 = pneg %p1928_p7 }
 0x3e8   : > { %p1934_p12 = pnand %p1933_p11, %p1929_p8 }
 0x3ea   : > { %1937 = shalt.err (!%p1934_p12)
}
 0x3eb   : > { %1864 = dma.vmem_to_hbm [thread:$0]  (%p2049_p5), %s1592_s10, 128, %s1589_s14, %s1447_s19  }
 0x3ec PF: > { %p1870_p13 = scmp.ge.s32.totalorder %s1972_s24, 2  ;;  %s1610_s12 = sand.u32 1, %s1960_s21  }
 0x3ed   : > { %s1611_s13 = scalar_lea.sflag [#allocation4], %s1610_s12 }
 0x3ee   : > { %p1867_p0 = pnand %p1870_p13, %p2053_p6 }
 0x3f0   : > { %p1868_p1 = pneg %p1867_p0 }
 0x3f2   : > { %1955 = dma.done.wait (%p1868_p1), %s1611_s13, 128  }
 0x3f3   : > { %1957 = vsyncadd (%p1868_p1), %s1611_s13, 4294967168  ;;  %p17_p2 = scmp.ge.s32.totalorder %s2036_s27, 4   ;;  %s3035_s21 = smov %s1964_s22 }
 0x3f4   : > { %s3036_s22 = smov %s1968_s23  ;;  %s3037_s23 = smov %s2047_s30 }
 0x3f5   : > { %s3038_s24 = smov %s2036_s27  ;;  %19 = sbr.rel (!%p17_p2) target bundleno = 3 (0x3), region = 127 }
 0x3fa   :  { %1616 = vsyncpa [#allocation4], 1 }
 0x3fb   :  { %1618 = vsyncpa [#allocation4 + $0x1], 1 }

</bundles_post_ra>
